<compile_context>
chip_gen: v5e
topology: v5e:2x2
jax: 0.10.0
libtpu: 0.0.40
codegen_flags: <defaults>
</compile_context>

<pallas_src>
import functools

import jax
import jax.numpy as jnp
from jax.experimental import pallas as pl
from jax.experimental.pallas import tpu as pltpu


# ----------------------------- fused Pallas kernel --------------------------

def _fused_model_kernel(patches_ref, stem_w_ref, stem_b_ref,
                        cell0_w_ref, cell0_b_ref,
                        cell_w_ref, cell_b_ref,
                        cls_w_ref, cls_b_ref,
                        o_ref, buf_ref, *, num_cells, c, hw):
    """One grid step = `samples_per_tile` full samples through the whole net.

    patches_ref : (TM, Kp)   bf16  im2col'ed stem input tile (K zero-padded)
    stem_w_ref  : (Kp, C)    bf16
    stem_b_ref  : (1, C)     f32
    cell0_w_ref : (C, C)     bf16  (W1_0 + W2_0): first cell folded
    cell0_b_ref : (1, C)     f32
    cell_w_ref  : (nc-1, 2C, C) bf16  parity-stacked [Wa;Wb] for cells 1..nc-1
    cell_b_ref  : (nc-1, 1, C)  f32
    cls_w_ref   : (C, NCLSP) bf16  (columns zero-padded to 128)
    cls_b_ref   : (1, NCLSP) f32
    o_ref       : (1, SPT, NCLSP) f32 logits block
    buf_ref     : (TM, 2C)   bf16  persistent activation scratch:
                  lanes [0:C] / [C:2C] hold x_prev / x_prevprev (roles swap
                  by parity; the cell output always overwrites the retiring
                  x_prevprev half -> zero-copy history shift).
    """
    # ---- stem: ReLU(conv3x3) as one im2col matmul (bf16 in, f32 acc) ----
    stem = jnp.dot(patches_ref[...], stem_w_ref[...],
                   preferred_element_type=jnp.float32)
    stem = jnp.maximum(stem + stem_b_ref[...], 0.0)            # (TM, C) f32
    stem_b16 = stem.astype(jnp.bfloat16)
    buf_ref[:, 0:c] = stem_b16          # half A: becomes x_prevprev of cell 1

    # ---- cell 0 folded: x_prev == x_prevprev == stem => one K=C dot ----
    out0 = jnp.dot(stem_b16, cell0_w_ref[...],
                   preferred_element_type=jnp.float32)
    out0 = jnp.maximum(out0 + cell0_b_ref[...], 0.0)
    buf_ref[:, c:2 * c] = out0.astype(jnp.bfloat16)   # half B: x_prev

    # ---- cells 1..nc-1: ONE K=2C dot each, straight from resident VMEM ----
    # (statically unrolled; num_cells is small.  TODO(synk): switch to
    #  lax.fori_loop / grid streaming for tens of cells.)
    for i in range(1, num_cells):
        acc = jnp.dot(buf_ref[...], cell_w_ref[i - 1],
                      preferred_element_type=jnp.float32)
        acc = jnp.maximum(acc + cell_b_ref[i - 1], 0.0)
        dst = c if i % 2 == 0 else 0      # overwrite the retiring x_prevprev
        buf_ref[:, dst:dst + c] = acc.astype(jnp.bfloat16)

    final_off = c if (num_cells - 1) % 2 == 0 else 0
    x_final = buf_ref[:, final_off:final_off + c]               # (TM, C) bf16

    # ---- classifier: linear head on every row, then per-sample GAP ----
    # (Linear and global-average-pool commute; doing the matmul first keeps
    #  the MXU M-dim large and avoids a dense pooling matrix entirely.)
    logit_rows = jnp.dot(x_final, cls_w_ref[...],
                         preferred_element_type=jnp.float32)    # (TM, NCLSP)
    spt = logit_rows.shape[0] // hw
    if spt == 1:
        logits = jnp.mean(logit_rows, axis=0, keepdims=True)    # (1, NCLSP)
    else:
        logits = jnp.mean(logit_rows.reshape(spt, hw, -1), axis=1)
    logits = logits + cls_b_ref[...]
    o_ref[0] = logits.astype(o_ref.dtype)


# ----------------------------- wrapper (glue) --------------------------------

def model_forward(x_nchw, params, *, samples_per_tile=1):
    """Mirrors Model.forward: stem -> cells(x_prev, x_prevprev) -> classifier."""
    N, Cin, H, W = x_nchw.shape
    C = params["stem_w"].shape[-1]
    ncls = params["cls_w"].shape[-1]
    HW = H * W
    M = N * HW
    num_cells = len(params["cells"])
    assert num_cells >= 1
    assert N % samples_per_tile == 0
    TM = samples_per_tile * HW
    assert TM % 8 == 0
    num_tiles = N // samples_per_tile

    # im2col for the 3x3 / pad=1 stem conv (cheap XLA glue; tile-streamed by
    # the grid below so only one (TM, Kp) block is resident at a time).
    x = jnp.transpose(x_nchw, (0, 2, 3, 1))                        # NHWC
    xpad = jnp.pad(x, ((0, 0), (1, 1), (1, 1), (0, 0)))
    taps = [xpad[:, kh:kh + H, kw:kw + W, :]
            for kh in range(3) for kw in range(3)]
    k_raw = 9 * Cin
    patches = jnp.concatenate(taps, axis=-1).reshape(M, k_raw)
    k_pad = ((k_raw + 127) // 128) * 128                           # lane-dense K
    patches = jnp.pad(patches, ((0, 0), (0, k_pad - k_raw))).astype(jnp.bfloat16)
    stem_w = jnp.pad(params["stem_w"].reshape(k_raw, C),
                     ((0, k_pad - k_raw), (0, 0))).astype(jnp.bfloat16)
    stem_b = params["stem_b"].astype(jnp.float32)

    # First cell folded (its two inputs are both the stem output).
    w1_0, w2_0, b_0 = params["cells"][0]
    cell0_w = (w1_0 + w2_0).astype(jnp.bfloat16)
    cell0_b = b_0.astype(jnp.float32)

    # Remaining cells: parity-aware [Wa;Wb] stacking so each cell is a single
    # K=2C dot against the combined (TM, 2C) activation buffer.
    #   cell i even: x_prev in lanes [0:C]  -> rows [W1_i ; W2_i]
    #   cell i odd : x_prev in lanes [C:2C] -> rows [W2_i ; W1_i]
    stk, stb = [], []
    for i in range(1, num_cells):
        w1, w2, b = params["cells"][i]
        stk.append(jnp.concatenate([w1, w2] if i % 2 == 0 else [w2, w1], axis=0))
        stb.append(b)
    if stk:
        cell_w = jnp.stack(stk).astype(jnp.bfloat16)               # (nc-1, 2C, C)
        cell_b = jnp.stack(stb).astype(jnp.float32)                # (nc-1, 1, C)
    else:  # num_cells == 1: dummy, never read by the kernel
        cell_w = jnp.zeros((1, 2 * C, C), jnp.bfloat16)
        cell_b = jnp.zeros((1, 1, C), jnp.float32)

    ncls_pad = ((ncls + 127) // 128) * 128                         # lane-dense out
    cls_w = jnp.pad(params["cls_w"],
                    ((0, 0), (0, ncls_pad - ncls))).astype(jnp.bfloat16)
    cls_b = jnp.pad(params["cls_b"],
                    ((0, 0), (0, ncls_pad - ncls))).astype(jnp.float32)

    kernel = functools.partial(_fused_model_kernel,
                               num_cells=num_cells, c=C, hw=HW)

    flops = (2 * M * (k_pad * C + C * C + (num_cells - 1) * 2 * C * C)
             + 2 * M * C * ncls_pad)
    bytes_accessed = (patches.size * 2 + stem_w.size * 2 + cell0_w.size * 2
                      + cell_w.size * 2 + cls_w.size * 2
                      + num_tiles * samples_per_tile * ncls_pad * 4)

    out = pl.pallas_call(
        kernel,
        out_shape=jax.ShapeDtypeStruct(
            (num_tiles, samples_per_tile, ncls_pad), jnp.float32),
        grid_spec=pltpu.PrefetchScalarGridSpec(
            num_scalar_prefetch=0,
            grid=(num_tiles,),
            in_specs=[
                pl.BlockSpec((TM, k_pad), lambda i: (i, 0)),        # streamed
                pl.BlockSpec((k_pad, C), lambda i: (0, 0)),         # resident
                pl.BlockSpec((1, C), lambda i: (0, 0)),
                pl.BlockSpec((C, C), lambda i: (0, 0)),
                pl.BlockSpec((1, C), lambda i: (0, 0)),
                pl.BlockSpec((cell_w.shape[0], 2 * C, C), lambda i: (0, 0, 0)),
                pl.BlockSpec((cell_b.shape[0], 1, C), lambda i: (0, 0, 0)),
                pl.BlockSpec((C, ncls_pad), lambda i: (0, 0)),
                pl.BlockSpec((1, ncls_pad), lambda i: (0, 0)),
            ],
            out_specs=pl.BlockSpec((1, samples_per_tile, ncls_pad),
                                   lambda i: (i, 0, 0)),
            scratch_shapes=[pltpu.VMEM((TM, 2 * C), jnp.bfloat16)],
        ),
        compiler_params=pltpu.CompilerParams(
            dimension_semantics=("parallel",)),
        cost_estimate=pl.CostEstimate(flops=flops, transcendentals=0,
                                      bytes_accessed=bytes_accessed),
    )(patches, stem_w, stem_b, cell0_w, cell0_b, cell_w, cell_b, cls_w, cls_b)

    return out.reshape(N, ncls_pad)[:, :ncls]


# --------------------------- pure-JAX reference ------------------------------

def reference_forward(x_nchw, params):
    """XLA reference of the same stand-in model (bf16 matmul inputs)."""
    N, Cin, H, W = x_nchw.shape
    C = params["stem_w"].shape[-1]
    HW = H * W
    bf = jnp.bfloat16
    x = jnp.transpose(x_nchw, (0, 2, 3, 1))
    xpad = jnp.pad(x, ((0, 0), (1, 1), (1, 1), (0, 0)))
    taps = [xpad[:, kh:kh + H, kw:kw + W, :]
            for kh in range(3) for kw in range(3)]
    patches = jnp.concatenate(taps, axis=-1).reshape(N * HW, 9 * Cin)
    stem = jnp.dot(patches.astype(bf), params["stem_w"].reshape(9 * Cin, C).astype(bf),
                   preferred_element_type=jnp.float32) + params["stem_b"]
    stem = jnp.maximum(stem, 0.0).astype(bf)
    x_prev, x_pp = stem, stem
    for (w1, w2, b) in params["cells"]:
        out = (jnp.dot(x_prev, w1.astype(bf), preferred_element_type=jnp.float32)
               + jnp.dot(x_pp, w2.astype(bf), preferred_element_type=jnp.float32)
               + b)
        x_pp, x_prev = x_prev, jnp.maximum(out, 0.0).astype(bf)
    pooled = jnp.mean(x_prev.astype(jnp.float32).reshape(N, HW, C), axis=1)
    logits = jnp.dot(pooled.astype(bf), params["cls_w"].astype(bf),
                     preferred_element_type=jnp.float32) + params["cls_b"]
    return logits


# ------------------------------- params / main --------------------------------

def init_params(key, cin, c, num_cells, no_classes):
    keys = jax.random.split(key, 3 + 2 * num_cells)
    params = {
        "stem_w": 0.1 * jax.random.normal(keys[0], (3, 3, cin, c), jnp.float32),
        "stem_b": jnp.zeros((1, c), jnp.float32),
        "cls_w": 0.1 * jax.random.normal(keys[1], (c, no_classes), jnp.float32),
        "cls_b": jnp.zeros((1, no_classes), jnp.float32),
        "cells": [],
    }
    for i in range(num_cells):
        w1 = 0.1 * jax.random.normal(keys[2 + 2 * i], (c, c), jnp.float32)
        w2 = 0.1 * jax.random.normal(keys[3 + 2 * i], (c, c), jnp.float32)
        b = jnp.zeros((1, c), jnp.float32)
        params["cells"].append((w1, w2, b))
    return params


if __name__ == "__main__":
    N, Cin, H, W = 2, 4, 16, 16
    C, NUM_CELLS, NO_CLASSES = 32, 3, 10

    key = jax.random.PRNGKey(0)
    k_x, k_p = jax.random.split(key)
    x = jax.random.normal(k_x, (N, Cin, H, W), jnp.float32)   # NCHW like PyTorch
    params = init_params(k_p, Cin, C, NUM_CELLS, NO_CLASSES)

    fwd = jax.jit(model_forward)
    out = jax.block_until_ready(fwd(x, params))
    assert out.shape == (N, NO_CLASSES), out.shape

    ref = jax.block_until_ready(reference_forward(x, params))
    max_err = float(jnp.max(jnp.abs(out - ref)))
    assert jnp.allclose(out, ref, atol=2e-2, rtol=2e-2), f"max abs err {max_err}"
    print("KERNEL_OK")
</pallas_src>

<mosaic_0001>
module attributes {stable_mosaic.version = 11 : i64} {
  func.func @_fused_model_kernel(%arg0: i32, %arg1: memref<256x128xbf16, #tpu.memory_space<vmem>>, %arg2: memref<128x32xbf16, #tpu.memory_space<vmem>>, %arg3: memref<1x32xf32, #tpu.memory_space<vmem>>, %arg4: memref<32x32xbf16, #tpu.memory_space<vmem>>, %arg5: memref<1x32xf32, #tpu.memory_space<vmem>>, %arg6: memref<2x64x32xbf16, #tpu.memory_space<vmem>>, %arg7: memref<2x1x32xf32, #tpu.memory_space<vmem>>, %arg8: memref<32x128xbf16, #tpu.memory_space<vmem>>, %arg9: memref<1x128xf32, #tpu.memory_space<vmem>>, %arg10: memref<1x1x128xf32, #tpu.memory_space<vmem>>, %arg11: memref<256x64xbf16, #tpu.memory_space<vmem>>) attributes {dimension_semantics = [#tpu.dimension_semantics<parallel>], iteration_bounds = array<i64: 2>, scalar_prefetch = 0 : i64, scratch_operands = 1 : i64, tpu.core_type = #tpu.core_type<tc>, window_params = [{transform_indices = @transform_0, window_bounds = array<i64: 256, 128>}, {pipeline_mode = #tpu.pipeline_mode<synchronous>, transform_indices = @transform_1, window_bounds = array<i64: 128, 32>}, {pipeline_mode = #tpu.pipeline_mode<synchronous>, transform_indices = @transform_2, window_bounds = array<i64: 1, 32>}, {pipeline_mode = #tpu.pipeline_mode<synchronous>, transform_indices = @transform_3, window_bounds = array<i64: 32, 32>}, {pipeline_mode = #tpu.pipeline_mode<synchronous>, transform_indices = @transform_4, window_bounds = array<i64: 1, 32>}, {pipeline_mode = #tpu.pipeline_mode<synchronous>, transform_indices = @transform_5, window_bounds = array<i64: 2, 64, 32>}, {pipeline_mode = #tpu.pipeline_mode<synchronous>, transform_indices = @transform_6, window_bounds = array<i64: 2, 1, 32>}, {pipeline_mode = #tpu.pipeline_mode<synchronous>, transform_indices = @transform_7, window_bounds = array<i64: 32, 128>}, {pipeline_mode = #tpu.pipeline_mode<synchronous>, transform_indices = @transform_8, window_bounds = array<i64: 1, 128>}, {transform_indices = @transform_9, window_bounds = array<i64: 1, 1, 128>}]} {
    %c0 = arith.constant 0 : index
    %c0_0 = arith.constant 0 : index
    %0 = vector.load %arg1[%c0, %c0_0] : memref<256x128xbf16, #tpu.memory_space<vmem>>, vector<256x128xbf16>
    %c0_1 = arith.constant 0 : index
    %c0_2 = arith.constant 0 : index
    %1 = vector.load %arg2[%c0_1, %c0_2] : memref<128x32xbf16, #tpu.memory_space<vmem>>, vector<128x32xbf16>
    %cst = arith.constant dense<0.000000e+00> : vector<256x32xf32>
    %2 = tpu.matmul %0, %1, %cst {dimension_numbers = #tpu.dot_dimension_numbers<[1], [0], [0], [1], [0, 0, 1, 1], [], []>} : vector<256x128xbf16>, vector<128x32xbf16>, vector<256x32xf32> -> vector<256x32xf32>
    %c0_3 = arith.constant 0 : index
    %c0_4 = arith.constant 0 : index
    %3 = vector.load %arg3[%c0_3, %c0_4] : memref<1x32xf32, #tpu.memory_space<vmem>>, vector<1x32xf32>
    %4 = vector.broadcast %3 : vector<1x32xf32> to vector<256x32xf32>
    %5 = arith.addf %2, %4 : vector<256x32xf32>
    %cst_5 = arith.constant 0.000000e+00 : f32
    %6 = vector.broadcast %cst_5 : f32 to vector<256x32xf32>
    %7 = arith.maximumf %5, %6 : vector<256x32xf32>
    %8 = arith.truncf %7 : vector<256x32xf32> to vector<256x32xbf16>
    %c0_6 = arith.constant 0 : index
    %c0_7 = arith.constant 0 : index
    %9 = vector.load %arg11[%c0_6, %c0_7] : memref<256x64xbf16, #tpu.memory_space<vmem>>, vector<256x32xbf16>
    tpu.vector_store %arg11[%c0_6, %c0_7], %8 {strides = array<i32>} : memref<256x64xbf16, #tpu.memory_space<vmem>>, vector<256x32xbf16>,
    %c0_8 = arith.constant 0 : index
    %c0_9 = arith.constant 0 : index
    %10 = vector.load %arg4[%c0_8, %c0_9] : memref<32x32xbf16, #tpu.memory_space<vmem>>, vector<32x32xbf16>
    %cst_10 = arith.constant dense<0.000000e+00> : vector<256x32xf32>
    %11 = tpu.matmul %8, %10, %cst_10 {dimension_numbers = #tpu.dot_dimension_numbers<[1], [0], [0], [1], [0, 0, 1, 1], [], []>} : vector<256x32xbf16>, vector<32x32xbf16>, vector<256x32xf32> -> vector<256x32xf32>
    %c0_11 = arith.constant 0 : index
    %c0_12 = arith.constant 0 : index
    %12 = vector.load %arg5[%c0_11, %c0_12] : memref<1x32xf32, #tpu.memory_space<vmem>>, vector<1x32xf32>
    %13 = vector.broadcast %12 : vector<1x32xf32> to vector<256x32xf32>
    %14 = arith.addf %11, %13 : vector<256x32xf32>
    %cst_13 = arith.constant 0.000000e+00 : f32
    %15 = vector.broadcast %cst_13 : f32 to vector<256x32xf32>
    %16 = arith.maximumf %14, %15 : vector<256x32xf32>
    %17 = arith.truncf %16 : vector<256x32xf32> to vector<256x32xbf16>
    %c0_14 = arith.constant 0 : index
    %c32 = arith.constant 32 : index
    %18 = vector.load %arg11[%c0_14, %c32] : memref<256x64xbf16, #tpu.memory_space<vmem>>, vector<256x32xbf16>
    tpu.vector_store %arg11[%c0_14, %c32], %17 {strides = array<i32>} : memref<256x64xbf16, #tpu.memory_space<vmem>>, vector<256x32xbf16>,
    %c0_15 = arith.constant 0 : index
    %c0_16 = arith.constant 0 : index
    %19 = vector.load %arg11[%c0_15, %c0_16] : memref<256x64xbf16, #tpu.memory_space<vmem>>, vector<256x64xbf16>
    %c0_17 = arith.constant 0 : index
    %c0_18 = arith.constant 0 : index
    %c0_19 = arith.constant 0 : index
    %20 = vector.load %arg6[%c0_17, %c0_18, %c0_19] : memref<2x64x32xbf16, #tpu.memory_space<vmem>>, vector<1x64x32xbf16>
    %21 = vector.shape_cast %20 : vector<1x64x32xbf16> to vector<64x32xbf16>
    %cst_20 = arith.constant dense<0.000000e+00> : vector<256x32xf32>
    %22 = tpu.matmul %19, %21, %cst_20 {dimension_numbers = #tpu.dot_dimension_numbers<[1], [0], [0], [1], [0, 0, 1, 1], [], []>} : vector<256x64xbf16>, vector<64x32xbf16>, vector<256x32xf32> -> vector<256x32xf32>
    %c0_21 = arith.constant 0 : index
    %c0_22 = arith.constant 0 : index
    %c0_23 = arith.constant 0 : index
    %23 = vector.load %arg7[%c0_21, %c0_22, %c0_23] : memref<2x1x32xf32, #tpu.memory_space<vmem>>, vector<1x1x32xf32>
    %24 = vector.shape_cast %23 : vector<1x1x32xf32> to vector<1x32xf32>
    %25 = vector.broadcast %24 : vector<1x32xf32> to vector<256x32xf32>
    %26 = arith.addf %22, %25 : vector<256x32xf32>
    %cst_24 = arith.constant 0.000000e+00 : f32
    %27 = vector.broadcast %cst_24 : f32 to vector<256x32xf32>
    %28 = arith.maximumf %26, %27 : vector<256x32xf32>
    %29 = arith.truncf %28 : vector<256x32xf32> to vector<256x32xbf16>
    %c0_25 = arith.constant 0 : index
    %c0_26 = arith.constant 0 : index
    %30 = vector.load %arg11[%c0_25, %c0_26] : memref<256x64xbf16, #tpu.memory_space<vmem>>, vector<256x32xbf16>
    tpu.vector_store %arg11[%c0_25, %c0_26], %29 {strides = array<i32>} : memref<256x64xbf16, #tpu.memory_space<vmem>>, vector<256x32xbf16>,
    %c0_27 = arith.constant 0 : index
    %c0_28 = arith.constant 0 : index
    %31 = vector.load %arg11[%c0_27, %c0_28] : memref<256x64xbf16, #tpu.memory_space<vmem>>, vector<256x64xbf16>
    %c1 = arith.constant 1 : index
    %c0_29 = arith.constant 0 : index
    %c0_30 = arith.constant 0 : index
    %32 = vector.load %arg6[%c1, %c0_29, %c0_30] : memref<2x64x32xbf16, #tpu.memory_space<vmem>>, vector<1x64x32xbf16>
    %33 = vector.shape_cast %32 : vector<1x64x32xbf16> to vector<64x32xbf16>
    %cst_31 = arith.constant dense<0.000000e+00> : vector<256x32xf32>
    %34 = tpu.matmul %31, %33, %cst_31 {dimension_numbers = #tpu.dot_dimension_numbers<[1], [0], [0], [1], [0, 0, 1, 1], [], []>} : vector<256x64xbf16>, vector<64x32xbf16>, vector<256x32xf32> -> vector<256x32xf32>
    %c1_32 = arith.constant 1 : index
    %c0_33 = arith.constant 0 : index
    %c0_34 = arith.constant 0 : index
    %35 = vector.load %arg7[%c1_32, %c0_33, %c0_34] : memref<2x1x32xf32, #tpu.memory_space<vmem>>, vector<1x1x32xf32>
    %36 = vector.shape_cast %35 : vector<1x1x32xf32> to vector<1x32xf32>
    %37 = vector.broadcast %36 : vector<1x32xf32> to vector<256x32xf32>
    %38 = arith.addf %34, %37 : vector<256x32xf32>
    %cst_35 = arith.constant 0.000000e+00 : f32
    %39 = vector.broadcast %cst_35 : f32 to vector<256x32xf32>
    %40 = arith.maximumf %38, %39 : vector<256x32xf32>
    %41 = arith.truncf %40 : vector<256x32xf32> to vector<256x32xbf16>
    %c0_36 = arith.constant 0 : index
    %c32_37 = arith.constant 32 : index
    %42 = vector.load %arg11[%c0_36, %c32_37] : memref<256x64xbf16, #tpu.memory_space<vmem>>, vector<256x32xbf16>
    tpu.vector_store %arg11[%c0_36, %c32_37], %41 {strides = array<i32>} : memref<256x64xbf16, #tpu.memory_space<vmem>>, vector<256x32xbf16>,
    %c0_38 = arith.constant 0 : index
    %c32_39 = arith.constant 32 : index
    %43 = vector.load %arg11[%c0_38, %c32_39] : memref<256x64xbf16, #tpu.memory_space<vmem>>, vector<256x32xbf16>
    %c0_40 = arith.constant 0 : index
    %c0_41 = arith.constant 0 : index
    %44 = vector.load %arg8[%c0_40, %c0_41] : memref<32x128xbf16, #tpu.memory_space<vmem>>, vector<32x128xbf16>
    %cst_42 = arith.constant dense<0.000000e+00> : vector<256x128xf32>
    %45 = tpu.matmul %43, %44, %cst_42 {dimension_numbers = #tpu.dot_dimension_numbers<[1], [0], [0], [1], [0, 0, 1, 1], [], []>} : vector<256x32xbf16>, vector<32x128xbf16>, vector<256x128xf32> -> vector<256x128xf32>
    %cst_43 = arith.constant dense<0.000000e+00> : vector<128xf32>
    %46 = vector.multi_reduction <add>, %45, %cst_43 [0] : vector<256x128xf32> to vector<128xf32>
    %47 = vector.shape_cast %46 : vector<128xf32> to vector<1x128xf32>
    %cst_44 = arith.constant 2.560000e+02 : f32
    %48 = vector.broadcast %cst_44 : f32 to vector<1x128xf32>
    %49 = arith.divf %47, %48 : vector<1x128xf32>
    %c0_45 = arith.constant 0 : index
    %c0_46 = arith.constant 0 : index
    %50 = vector.load %arg9[%c0_45, %c0_46] : memref<1x128xf32, #tpu.memory_space<vmem>>, vector<1x128xf32>
    %51 = arith.addf %49, %50 : vector<1x128xf32>
    %c0_47 = arith.constant 0 : index
    %c0_48 = arith.constant 0 : index
    %c0_49 = arith.constant 0 : index
    %52 = vector.load %arg10[%c0_47, %c0_48, %c0_49] : memref<1x1x128xf32, #tpu.memory_space<vmem>>, vector<1x1x128xf32>
    %53 = vector.shape_cast %52 : vector<1x1x128xf32> to vector<1x128xf32>
    %54 = vector.shape_cast %51 : vector<1x128xf32> to vector<1x1x128xf32>
    tpu.vector_store %arg10[%c0_47, %c0_48, %c0_49], %54 {strides = array<i32>} : memref<1x1x128xf32, #tpu.memory_space<vmem>>, vector<1x1x128xf32>,
    return
  }
  func.func @transform_0(%arg0: i32) -> (i32, i32) {
    %c0_i32 = arith.constant 0 : i32
    %c0_i32_0 = arith.constant 0 : i32
    return %arg0, %c0_i32 : i32, i32
  }
  func.func @transform_1(%arg0: i32) -> (i32, i32) {
    %c0_i32 = arith.constant 0 : i32
    %c0_i32_0 = arith.constant 0 : i32
    %c0_i32_1 = arith.constant 0 : i32
    return %c0_i32, %c0_i32_0 : i32, i32
  }
  func.func @transform_2(%arg0: i32) -> (i32, i32) {
    %c0_i32 = arith.constant 0 : i32
    %c0_i32_0 = arith.constant 0 : i32
    %c0_i32_1 = arith.constant 0 : i32
    return %c0_i32, %c0_i32_0 : i32, i32
  }
  func.func @transform_3(%arg0: i32) -> (i32, i32) {
    %c0_i32 = arith.constant 0 : i32
    %c0_i32_0 = arith.constant 0 : i32
    %c0_i32_1 = arith.constant 0 : i32
    return %c0_i32, %c0_i32_0 : i32, i32
  }
  func.func @transform_4(%arg0: i32) -> (i32, i32) {
    %c0_i32 = arith.constant 0 : i32
    %c0_i32_0 = arith.constant 0 : i32
    %c0_i32_1 = arith.constant 0 : i32
    return %c0_i32, %c0_i32_0 : i32, i32
  }
  func.func @transform_5(%arg0: i32) -> (i32, i32, i32) {
    %c0_i32 = arith.constant 0 : i32
    %c0_i32_0 = arith.constant 0 : i32
    %c0_i32_1 = arith.constant 0 : i32
    %c0_i32_2 = arith.constant 0 : i32
    return %c0_i32, %c0_i32_0, %c0_i32_1 : i32, i32, i32
  }
  func.func @transform_6(%arg0: i32) -> (i32, i32, i32) {
    %c0_i32 = arith.constant 0 : i32
    %c0_i32_0 = arith.constant 0 : i32
    %c0_i32_1 = arith.constant 0 : i32
    %c0_i32_2 = arith.constant 0 : i32
    return %c0_i32, %c0_i32_0, %c0_i32_1 : i32, i32, i32
  }
  func.func @transform_7(%arg0: i32) -> (i32, i32) {
    %c0_i32 = arith.constant 0 : i32
    %c0_i32_0 = arith.constant 0 : i32
    %c0_i32_1 = arith.constant 0 : i32
    return %c0_i32, %c0_i32_0 : i32, i32
  }
  func.func @transform_8(%arg0: i32) -> (i32, i32) {
    %c0_i32 = arith.constant 0 : i32
    %c0_i32_0 = arith.constant 0 : i32
    %c0_i32_1 = arith.constant 0 : i32
    return %c0_i32, %c0_i32_0 : i32, i32
  }
  func.func @transform_9(%arg0: i32) -> (i32, i32, i32) {
    %c0_i32 = arith.constant 0 : i32
    %c0_i32_0 = arith.constant 0 : i32
    %c0_i32_1 = arith.constant 0 : i32
    return %arg0, %c0_i32, %c0_i32_0 : i32, i32, i32
  }
}

</mosaic_0001>

<bundles_post_ra>
// kernel: model_forward.1
= control target key start
LH: loop header
LB: loop body
LE: loop exit
PB: predicated region body
PF: predicated region fallthrough
CT: control target
= control target key end

     0   :  { %14 = vsyncpa [#allocation4], 0  ;;  %s3750_s0 = inlined_call_operand.vmem [shape: bf16[512,128], index: 0, kind: input, shape index: {}]   ;;  %s3751_s1 = inlined_call_operand.vmem [shape: bf16[128,32], index: 1, kind: input, shape index: {}]   ;;  %s3752_s2 = inlined_call_operand.vmem [shape: f32[1,32], index: 2, kind: input, shape index: {}]   ;;  %s3753_s3 = inlined_call_operand.vmem [shape: bf16[32,32], index: 3, kind: input, shape index: {}]   ;;  %s3754_s4 = inlined_call_operand.vmem [shape: f32[1,32], index: 4, kind: input, shape index: {}]   ;;  %s3755_s5 = inlined_call_operand.vmem [shape: bf16[2,64,32], index: 5, kind: input, shape index: {}]   ;;  %s3756_s6 = inlined_call_operand.vmem [shape: f32[2,1,32], index: 6, kind: input, shape index: {}]   ;;  %s3757_s7 = inlined_call_operand.vmem [shape: bf16[32,128], index: 7, kind: input, shape index: {}]   ;;  %s3758_s8 = inlined_call_operand.vmem [shape: f32[1,128], index: 8, kind: input, shape index: {}]   ;;  %s3759_s9 = inlined_call_operand.hbm [shape: f32[2,1,128], index: 9, kind: output, shape index: {}]  }
   0x1   :  { %16 = vsyncpa [#allocation4 + $0x1], 0  ;;  %s3156_s30 = smov 0   ;;  %s3158_s10 = smov 0  }
   0x2   :  { %s3160_s11 = smov 0   ;;  %s3162_s12 = smov 0  }
   0x3 LB: > { %s3177_s13 = sadd.s32 4294967295, %s3101_s12   ;;  %s2484_s14 = sadd.s32 4294967294, %s3101_s12   ;;  %s3101_s12 = sphi %s3162_s12, %s3765_s12   ;;  %s3097_s11 = sphi %s3160_s11, %s3764_s11   ;;  %s3093_s10 = sphi %s3158_s10, %s3763_s10   ;;  %s3089_s30 = sphi %s3156_s30, %s3762_s30  }
   0x4   : > { %s3181_s15 = sadd.s32 1, %s3101_s12   ;;  %s223_s16 = sadd.s32 1, %s3097_s11 }
   0x5   : > { %s220_s17 = ssub.s32 %s3101_s12, %s3181_s15  ;;  %p233_p0 = scmp.ne.s32.totalorder %s3097_s11, %s3093_s10 }
   0x6   : > { %p221_p1 = scmp.eq.s32.totalorder %s220_s17, 0  ;;  %p234_p2 = scmp.eq.s32.totalorder %s3177_s13, 1 }
   0x7   : > { %p239_p3 = scmp.ne.s32.totalorder %s3093_s10, %s3089_s30  ;;  %p240_p4 = scmp.eq.s32.totalorder %s2484_s14, 1 }
   0x8   : > { %s3192_s18 = scalar_select %p221_p1, %s3097_s11, %s223_s16  }
   0x9   : > { %p3194_p5 = por %p234_p2, %p233_p0  ;;  %p3198_p6 = por %p240_p4, %p239_p3 }
   0xa   : > { %p2487_p7 = scmp.ge.s32.totalorder %s3101_s12, 1  ;;  %p291_p8 = scmp.lt.s32.totalorder %s3101_s12, 3 }
   0xc   : > { %p292_p9 = pnand %p2487_p7, %p291_p8 }
   0xd   : > { %s2488_s16 = sshll.u32 (!%p292_p9), %s3177_s13, 5  ;;  %s3104_s24 = smov (!%p292_p9), 96  }
   0xe   : > { %295 = sbr.rel (%p292_p9) target bundleno = 1503 (0x5df), region = 56  ;;  %p327_p10 = scmp.lt.s32.totalorder (!%p292_p9), %s2488_s16, 63 }
  0x13   : > { %v2924_v0 = vld [vmem:[%s3751_s1 + $0x38] sm:$0xff]  ;;  %v2923_v1 = vld [vmem:[%s3751_s1 + $0x30] sm:$0xff]  ;;  %v2926_v2 = vld [vmem:[%s3753_s3 + $0x8] sm:$0xff]  ;;  %s3767_s16 = smov (!%p327_p10, %s2488_s16), 63  ;;  %vm682_vm0 = vcmask 257024   ;;  %vm815_vm1 = vcmask 261120  }
  0x14   : > { %529 = vmatpush.bf16.msra.mxu0 %v2924_v0  ;;  %2985 = vmatpush.bf16.msra.mxu1 %v2926_v2  ;;  %v2922_v3 = vld [vmem:[%s3751_s1 + $0x28] sm:$0xff]  ;;  %v2921_v4 = vld [vmem:[%s3751_s1 + $0x20] sm:$0xff]  ;;  %v2920_v5 = vld [vmem:[%s3751_s1 + $0x18] sm:$0xff]  ;;  %s2489_s26 = sshll.u32 %s3767_s16, 2  ;;  %vm1145_vm2 = vcmask 519424   ;;  %vm1326_vm3 = vcmask 523264   ;;  %s2425_s16 = scalar_lea.hbm %s3759_s9, %s3177_s13 }
  0x15   : > { %2986 = vmatpush.bf16.msra.mxu2 %v2926_v2  ;;  %2987 = vmatpush.bf16.msra.mxu3 %v2926_v2  ;;  %v2919_v6 = vld [vmem:[%s3751_s1 + $0x10] sm:$0xff]  ;;  %v2918_v7 = vld [vmem:[%s3751_s1 + $0x8] sm:$0xff]  ;;  %v2917_v8 = vld [vmem:[%s3751_s1] sm:$0xff]  ;;  %s3235_s17 = scalar_lea.vmem %s3750_s0, %s2489_s26  ;;  %s3103_s26 = smov 32  }
  0x16   : > { %v2901_v9 = vld [vmem:[%s3235_s17] sm:$0xff]  ;;  %v2902_v10 = vld [vmem:[%s3235_s17 + $0x8] sm:$0xff]  ;;  %v2903_v11 = vld [vmem:[%s3235_s17 + $0x10] sm:$0xff]  ;;  %s2429_s25 = sshll.u32 %s2425_s16, 4  ;;  %s2430_s25 = int_to_ptr.hbm [resolvable:$true] %s2429_s25 }
  0x17   : > { %v2904_v12 = vld [vmem:[%s3235_s17 + $0x18] sm:$0xff]  ;;  %v2905_v13 = vld [vmem:[%s3235_s17 + $0x20] sm:$0xff]  ;;  %v2906_v14 = vld [vmem:[%s3235_s17 + $0x28] sm:$0xff]  ;;  %s3053_s28 = sshra.s32 %s2430_s25, 4  ;;  %s3054_s28 = int_to_ptr.hbm [resolvable:$true] %s3053_s28 }
  0x18   : > { %530 = vmatpush.bf16.msra.mxu0 %v2923_v1  ;;  %v2907_v15 = vld [vmem:[%s3235_s17 + $0x30] sm:$0xff]  ;;  %v2925_v16 = vld [vmem:[%s3753_s3] sm:$0xff]  ;;  %v2908_v17 = vld [vmem:[%s3235_s17 + $0x38] sm:$0xff]  ;;  %s3055_s29 = scalar_lea.hbm %s3054_s28, 1  ;;  %p3060_p0 = scmp.lt.s32.totalorder %s3054_s28, %s3759_s9 }
  0x19   : > { %2988 = vmatpush.bf16.msra.mxu1 %v2925_v16  ;;  %2989 = vmatpush.bf16.msra.mxu2 %v2925_v16  ;;  %v3251_v18 = vld [vmem:[%s3752_s2] ss:$0 sm:$0xff]  ;;  %v2910_v30 = vld [vmem:[%s3235_s17 + $0x48] sm:$0xff]  ;;  %v2911_v42 = vld [vmem:[%s3235_s17 + $0x50] sm:$0xff]  ;;  %p3056_p11 = scmp.ne.s32.totalorder %s3054_s28, %s3055_s29 }
  0x1a   : > { %2990 = vmatpush.bf16.msra.mxu3 %v2925_v16  ;;  %v2909_v19 = vld [vmem:[%s3235_s17 + $0x40] sm:$0xff]  ;;  %v2912_v54 = vld [vmem:[%s3235_s17 + $0x58] sm:$0xff] }
  0x1b   : > { %p3057_p12 = pnand %p3056_p11, %p3194_p5 }
  0x1c   : > { %531 = vmatpush.bf16.msra.mxu0 %v2922_v3 }
  0x1d   : > { %p3058_p13 = pneg %p3057_p12 }
  0x20   : > { %532 = vmatpush.bf16.msra.mxu0 %v2921_v4 }
  0x24   : > { %533 = vmatpush.bf16.msra.mxu0 %v2920_v5 }
  0x28   : > { %534 = vmatpush.bf16.msra.mxu0 %v2919_v6 }
  0x2c   : > { %535 = vmatpush.bf16.msra.mxu0 %v2918_v7 }
  0x30   : > { %536 = vmatpush.bf16.msra.mxu0 %v2917_v8 }
  0x33   : > { %537 = vmatmul.bf16.vlgmr.msra.gmra.mxu0 %v2901_v9 }
  0x34   : > { %870 = vmatpush.bf16.msrb.mxu0 %v2926_v2  ;;  %v2913_v2 = vld [vmem:[%s3235_s17 + $0x60] sm:$0xff] }
  0x38   : > { %871 = vmatpush.bf16.msrb.mxu0 %v2925_v16 }
  0x43   : > { %542 = vmatmul.bf16.gmra.mxu0 %v2902_v10 }
  0x53   : > { %547 = vmatmul.bf16.gmra.mxu0 %v2903_v11 }
  0x63   : > { %552 = vmatmul.bf16.gmra.mxu0 %v2904_v12 }
  0x73   : > { %557 = vmatmul.bf16.gmra.mxu0 %v2905_v13 }
  0x83   : > { %562 = vmatmul.bf16.gmra.mxu0 %v2906_v14  ;;  %v2914_v14 = vld [vmem:[%s3235_s17 + $0x68] sm:$0xff] }
  0x93   : > { %567 = vmatmul.bf16.gmra.mxu0 %v2907_v15 }
  0xa3   : > { %572 = vmatmul.bf16.gmra.mxu0 %v2908_v17 }
  0xb0   : > { %v538_v20 = vpop.f32.mrf.mxu0 }
  0xb1   : > { %v539_v21 = vadd.f32 %v3251_v18, %v538_v20 }
  0xb3   : > { %v618_v22 = vmax.f32 %v539_v21, 0.0  ;;  %577 = vmatmul.bf16.gmra.mxu0 %v2909_v19 }
  0xb5   : > { %v650_v23 = vpack.c.bf16 %v618_v22, %v618_v22 }
  0xb7   : > { %683 = vst.msk [vmem:[#allocation2] sm:$0xf] %vm682_vm0, %v650_v23  ;;  %v755_v28 = vunpack.c.l.b16 %v650_v23 }
  0xb8   : > { %v540_v24 = vpop.f32.mrf.mxu0 }
  0xb9   : > { %v541_v25 = vadd.f32 %v3251_v18, %v540_v24 }
  0xbb   : > { %v619_v26 = vmax.f32 %v541_v25, 0.0 }
  0xbd   : > { %v651_v27 = vpack.c.bf16 %v619_v26, %v619_v26 }
  0xbf   : > { %v756_v29 = vunpack.c.l.b16 %v651_v27  ;;  %684 = vst.msk [vmem:[#allocation2 + $0x4] sm:$0xf] %vm682_vm0, %v651_v27  ;;  %v2915_v27 = vld [vmem:[%s3235_s17 + $0x70] sm:$0xff] }
  0xc0   : > { %v543_v31 = vpop.f32.mrf.mxu0 }
  0xc1   : > { %v3259_v32 = vpack.c.b16 %v756_v29, %v755_v28  ;;  %v544_v33 = vadd.f32 %v3251_v18, %v543_v31 }
  0xc3   : > { %v620_v34 = vmax.f32 %v544_v33, 0.0  ;;  %582 = vmatmul.bf16.gmra.mxu0 %v2910_v30 }
  0xc5   : > { %v652_v35 = vpack.c.bf16 %v620_v34, %v620_v34 }
  0xc7   : > { %685 = vst.msk [vmem:[#allocation2 + $0x8] sm:$0xf] %vm682_vm0, %v652_v35  ;;  %v757_v40 = vunpack.c.l.b16 %v652_v35 }
  0xc8   : > { %v545_v36 = vpop.f32.mrf.mxu0 }
  0xc9   : > { %v546_v37 = vadd.f32 %v3251_v18, %v545_v36 }
  0xcb   : > { %v621_v38 = vmax.f32 %v546_v37, 0.0 }
  0xcd   : > { %v653_v39 = vpack.c.bf16 %v621_v38, %v621_v38 }
  0xcf   : > { %v758_v41 = vunpack.c.l.b16 %v653_v39  ;;  %686 = vst.msk [vmem:[#allocation2 + $0xc] sm:$0xf] %vm682_vm0, %v653_v39 }
  0xd0   : > { %v548_v43 = vpop.f32.mrf.mxu0 }
  0xd1   : > { %v549_v44 = vadd.f32 %v3251_v18, %v548_v43  ;;  %v788_v45 = vpack.c.b16 %v758_v41, %v757_v40  ;;  %v2916_v40 = vld [vmem:[%s3235_s17 + $0x78] sm:$0xff]  ;;  %s3059_s17 = scalar_lea.hbm %s3759_s9, 2 }
  0xd2   : > { %p3061_p1 = scmp.lt.s32.totalorder %s3059_s17, %s3055_s29 }
  0xd3   : > { %v622_v46 = vmax.f32 %v549_v44, 0.0  ;;  %587 = vmatmul.bf16.gmra.mxu0 %v2911_v42  ;;  %2595 = vmatmul.msk.bf16.vlgmr.msra.gmra.mxu1 %vm815_vm1, %v788_v45 }
  0xd4   : > { %p3062_p2 = por %p3061_p1, %p3060_p0 }
  0xd5   : > { %v654_v47 = vpack.c.bf16 %v622_v46, %v622_v46 }
  0xd6   : > { %p3063_p3 = pnand %p3062_p2, %p3058_p13 }
  0xd7   : > { %687 = vst.msk [vmem:[#allocation2 + $0x10] sm:$0xf] %vm682_vm0, %v654_v47  ;;  %v759_v52 = vunpack.c.l.b16 %v654_v47 }
  0xd8   : > { %v550_v48 = vpop.f32.mrf.mxu0 }
  0xd9   : > { %v551_v49 = vadd.f32 %v3251_v18, %v550_v48 }
  0xdb   : > { %v623_v50 = vmax.f32 %v551_v49, 0.0 }
  0xdd   : > { %v655_v51 = vpack.c.bf16 %v623_v50, %v623_v50 }
  0xdf   : > { %v760_v53 = vunpack.c.l.b16 %v655_v51  ;;  %688 = vst.msk [vmem:[#allocation2 + $0x14] sm:$0xf] %vm682_vm0, %v655_v51 }
  0xe0   : > { %v553_v55 = vpop.f32.mrf.mxu0 }
  0xe1   : > { %v554_v56 = vadd.f32 %v3251_v18, %v553_v55  ;;  %v789_v57 = vpack.c.b16 %v760_v53, %v759_v52 }
  0xe3   : > { %v624_v58 = vmax.f32 %v554_v56, 0.0  ;;  %592 = vmatmul.bf16.gmra.mxu0 %v2912_v54  ;;  %2596 = vmatmul.msk.bf16.gmra.mxu1 %vm815_vm1, %v789_v57 }
  0xe5   : > { %v656_v59 = vpack.c.bf16 %v624_v58, %v624_v58 }
  0xe7   : > { %689 = vst.msk [vmem:[#allocation2 + $0x18] sm:$0xf] %vm682_vm0, %v656_v59  ;;  %v761_v0 = vunpack.c.l.b16 %v656_v59 }
  0xe8   : > { %v555_v60 = vpop.f32.mrf.mxu0 }
  0xe9   : > { %v556_v61 = vadd.f32 %v3251_v18, %v555_v60 }
  0xeb   : > { %v625_v62 = vmax.f32 %v556_v61, 0.0 }
  0xed   : > { %v657_v63 = vpack.c.bf16 %v625_v62, %v625_v62 }
  0xef   : > { %v762_v1 = vunpack.c.l.b16 %v657_v63  ;;  %690 = vst.msk [vmem:[#allocation2 + $0x1c] sm:$0xf] %vm682_vm0, %v657_v63 }
  0xf0   : > { %v558_v3 = vpop.f32.mrf.mxu0 }
  0xf1   : > { %v559_v4 = vadd.f32 %v3251_v18, %v558_v3  ;;  %v790_v5 = vpack.c.b16 %v762_v1, %v761_v0 }
  0xf3   : > { %v626_v6 = vmax.f32 %v559_v4, 0.0  ;;  %597 = vmatmul.bf16.gmra.mxu0 %v2913_v2  ;;  %2597 = vmatmul.msk.bf16.gmra.mxu1 %vm815_vm1, %v790_v5 }
  0xf5   : > { %v658_v7 = vpack.c.bf16 %v626_v6, %v626_v6 }
  0xf7   : > { %691 = vst.msk [vmem:[#allocation2 + $0x20] sm:$0xf] %vm682_vm0, %v658_v7  ;;  %v763_v12 = vunpack.c.l.b16 %v658_v7  ;;  %v3315_v7 = vld [vmem:[%s3754_s4] ss:$0 sm:$0xff] }
  0xf8   : > { %v560_v8 = vpop.f32.mrf.mxu0 }
  0xf9   : > { %v561_v9 = vadd.f32 %v3251_v18, %v560_v8 }
  0xfb   : > { %v627_v10 = vmax.f32 %v561_v9, 0.0 }
  0xfd   : > { %v659_v11 = vpack.c.bf16 %v627_v10, %v627_v10 }
  0xff   : > { %v764_v13 = vunpack.c.l.b16 %v659_v11  ;;  %692 = vst.msk [vmem:[#allocation2 + $0x24] sm:$0xf] %vm682_vm0, %v659_v11 }
 0x100   : > { %v563_v15 = vpop.f32.mrf.mxu0 }
 0x101   : > { %v564_v16 = vadd.f32 %v3251_v18, %v563_v15  ;;  %v791_v17 = vpack.c.b16 %v764_v13, %v763_v12 }
 0x103   : > { %v628_v19 = vmax.f32 %v564_v16, 0.0  ;;  %602 = vmatmul.bf16.gmra.mxu0 %v2914_v14  ;;  %2598 = vmatmul.msk.bf16.gmra.mxu1 %vm815_vm1, %v791_v17 }
 0x105   : > { %v660_v20 = vpack.c.bf16 %v628_v19, %v628_v19 }
 0x107   : > { %693 = vst.msk [vmem:[#allocation2 + $0x28] sm:$0xf] %vm682_vm0, %v660_v20  ;;  %v765_v25 = vunpack.c.l.b16 %v660_v20 }
 0x108   : > { %v565_v21 = vpop.f32.mrf.mxu0 }
 0x109   : > { %v566_v22 = vadd.f32 %v3251_v18, %v565_v21 }
 0x10b   : > { %v629_v23 = vmax.f32 %v566_v22, 0.0 }
 0x10d   : > { %v661_v24 = vpack.c.bf16 %v629_v23, %v629_v23 }
 0x10f   : > { %694 = vst.msk [vmem:[#allocation2 + $0x2c] sm:$0xf] %vm682_vm0, %v661_v24  ;;  %v766_v26 = vunpack.c.l.b16 %v661_v24 }
 0x110   : > { %v568_v28 = vpop.f32.mrf.mxu0 }
 0x111   : > { %v569_v29 = vadd.f32 %v3251_v18, %v568_v28  ;;  %v792_v30 = vpack.c.b16 %v766_v26, %v765_v25 }
 0x113   : > { %v630_v31 = vmax.f32 %v569_v29, 0.0  ;;  %607 = vmatmul.bf16.gmra.mxu0 %v2915_v27  ;;  %2599 = vmatmul.msk.bf16.gmra.mxu1 %vm815_vm1, %v792_v30 }
 0x115   : > { %v662_v33 = vpack.c.bf16 %v630_v31, %v630_v31 }
 0x117   : > { %695 = vst.msk [vmem:[#allocation2 + $0x30] sm:$0xf] %vm682_vm0, %v662_v33  ;;  %v767_v38 = vunpack.c.l.b16 %v662_v33 }
 0x118   : > { %v570_v34 = vpop.f32.mrf.mxu0 }
 0x119   : > { %v571_v35 = vadd.f32 %v3251_v18, %v570_v34 }
 0x11b   : > { %v631_v36 = vmax.f32 %v571_v35, 0.0 }
 0x11d   : > { %v663_v37 = vpack.c.bf16 %v631_v36, %v631_v36 }
 0x11f   : > { %696 = vst.msk [vmem:[#allocation2 + $0x34] sm:$0xf] %vm682_vm0, %v663_v37  ;;  %v768_v39 = vunpack.c.l.b16 %v663_v37 }
 0x120   : > { %v573_v41 = vpop.f32.mrf.mxu0 }
 0x121   : > { %v574_v42 = vadd.f32 %v3251_v18, %v573_v41  ;;  %v793_v43 = vpack.c.b16 %v768_v39, %v767_v38 }
 0x123   : > { %v632_v44 = vmax.f32 %v574_v42, 0.0  ;;  %612 = vmatmul.bf16.gmra.mxu0 %v2916_v40  ;;  %2600 = vmatmul.msk.bf16.vlgmr.msra.gmra.mxu2 %vm815_vm1, %v793_v43 }
 0x125   : > { %v664_v45 = vpack.c.bf16 %v632_v44, %v632_v44 }
 0x127   : > { %697 = vst.msk [vmem:[#allocation2 + $0x38] sm:$0xf] %vm682_vm0, %v664_v45  ;;  %v769_v50 = vunpack.c.l.b16 %v664_v45 }
 0x128   : > { %v575_v46 = vpop.f32.mrf.mxu0 }
 0x129   : > { %v576_v47 = vadd.f32 %v3251_v18, %v575_v46 }
 0x12b   : > { %v633_v48 = vmax.f32 %v576_v47, 0.0 }
 0x12d   : > { %v665_v49 = vpack.c.bf16 %v633_v48, %v633_v48 }
 0x12f   : > { %698 = vst.msk [vmem:[#allocation2 + $0x3c] sm:$0xf] %vm682_vm0, %v665_v49  ;;  %v770_v51 = vunpack.c.l.b16 %v665_v49 }
 0x130   : > { %v578_v52 = vpop.f32.mrf.mxu0 }
 0x131   : > { %v579_v53 = vadd.f32 %v3251_v18, %v578_v52  ;;  %v794_v54 = vpack.c.b16 %v770_v51, %v769_v50 }
 0x133   : > { %v634_v55 = vmax.f32 %v579_v53, 0.0  ;;  %2594 = vmatmul.msk.bf16.vlgmr.msrb.gmra.mxu0 %vm815_vm1, %v3259_v32  ;;  %2601 = vmatmul.msk.bf16.gmra.mxu2 %vm815_vm1, %v794_v54 }
 0x135   : > { %v666_v56 = vpack.c.bf16 %v634_v55, %v634_v55 }
 0x137   : > { %699 = vst.msk [vmem:[#allocation2 + $0x40] sm:$0xf] %vm682_vm0, %v666_v56  ;;  %v771_v61 = vunpack.c.l.b16 %v666_v56 }
 0x138   : > { %v580_v57 = vpop.f32.mrf.mxu0 }
 0x139   : > { %v581_v58 = vadd.f32 %v3251_v18, %v580_v57 }
 0x13b   : > { %v635_v59 = vmax.f32 %v581_v58, 0.0 }
 0x13d   : > { %v667_v60 = vpack.c.bf16 %v635_v59, %v635_v59 }
 0x13f   : > { %700 = vst.msk [vmem:[#allocation2 + $0x44] sm:$0xf] %vm682_vm0, %v667_v60  ;;  %v772_v62 = vunpack.c.l.b16 %v667_v60 }
 0x140   : > { %v583_v63 = vpop.f32.mrf.mxu0 }
 0x141   : > { %v584_v0 = vadd.f32 %v3251_v18, %v583_v63  ;;  %v795_v1 = vpack.c.b16 %v772_v62, %v771_v61 }
 0x143   : > { %v636_v2 = vmax.f32 %v584_v0, 0.0  ;;  %2602 = vmatmul.msk.bf16.gmra.mxu2 %vm815_vm1, %v795_v1 }
 0x145   : > { %v668_v32 = vpack.c.bf16 %v636_v2, %v636_v2 }
 0x147   : > { %701 = vst.msk [vmem:[#allocation2 + $0x48] sm:$0xf] %vm682_vm0, %v668_v32  ;;  %v773_v8 = vunpack.c.l.b16 %v668_v32 }
 0x148   : > { %v585_v3 = vpop.f32.mrf.mxu0 }
 0x149   : > { %v586_v4 = vadd.f32 %v3251_v18, %v585_v3 }
 0x14b   : > { %v637_v5 = vmax.f32 %v586_v4, 0.0 }
 0x14d   : > { %v669_v6 = vpack.c.bf16 %v637_v5, %v637_v5 }
 0x14f   : > { %702 = vst.msk [vmem:[#allocation2 + $0x4c] sm:$0xf] %vm682_vm0, %v669_v6  ;;  %v774_v9 = vunpack.c.l.b16 %v669_v6 }
 0x150   : > { %v588_v10 = vpop.f32.mrf.mxu0  ;;  %v878_v11 = vpop.f32.mrf.mxu1 }
 0x151   : > { %v589_v12 = vadd.f32 %v3251_v18, %v588_v10  ;;  %v879_v13 = vadd.f32 %v3315_v7, %v878_v11  ;;  %v796_v14 = vpack.c.b16 %v774_v9, %v773_v8 }
 0x153   : > { %v638_v15 = vmax.f32 %v589_v12, 0.0  ;;  %v955_v16 = vmax.f32 %v879_v13, 0.0  ;;  %2603 = vmatmul.msk.bf16.gmra.mxu2 %vm815_vm1, %v796_v14 }
 0x155   : > { %v670_v17 = vpack.c.bf16 %v638_v15, %v638_v15  ;;  %v987_v19 = vpack.c.bf16 %v955_v16, %v955_v16 }
 0x157   : > { %703 = vst.msk [vmem:[#allocation2 + $0x50] sm:$0xf] %vm682_vm0, %v670_v17  ;;  %1053 = vrot.lane.b32.xlu1 %v987_v19, %s3103_s26  ;;  %v775_v28 = vunpack.c.l.b16 %v670_v17 }
 0x158   : > { %v590_v20 = vpop.f32.mrf.mxu0  ;;  %v880_v21 = vpop.f32.mrf.mxu1 }
 0x159   : > { %v591_v22 = vadd.f32 %v3251_v18, %v590_v20  ;;  %v881_v23 = vadd.f32 %v3315_v7, %v880_v21 }
 0x15b   : > { %v639_v24 = vmax.f32 %v591_v22, 0.0  ;;  %v956_v25 = vmax.f32 %v881_v23, 0.0 }
 0x15d   : > { %v671_v26 = vpack.c.bf16 %v639_v24, %v639_v24  ;;  %v988_v27 = vpack.c.bf16 %v956_v25, %v956_v25 }
 0x15f   : > { %704 = vst.msk [vmem:[#allocation2 + $0x54] sm:$0xf] %vm682_vm0, %v671_v26  ;;  %v776_v29 = vunpack.c.l.b16 %v671_v26  ;;  %1055 = vrot.lane.b32.xlu1 %v988_v27, %s3103_s26 }
 0x160   : > { %v593_v30 = vpop.f32.mrf.mxu0  ;;  %v883_v31 = vpop.f32.mrf.mxu1 }
 0x161   : > { %v594_v33 = vadd.f32 %v3251_v18, %v593_v30  ;;  %v884_v34 = vadd.f32 %v3315_v7, %v883_v31  ;;  %v797_v35 = vpack.c.b16 %v776_v29, %v775_v28 }
 0x163   : > { %v640_v36 = vmax.f32 %v594_v33, 0.0  ;;  %v957_v37 = vmax.f32 %v884_v34, 0.0  ;;  %2604 = vmatmul.msk.bf16.gmra.mxu2 %vm815_vm1, %v797_v35 }
 0x165   : > { %v672_v38 = vpack.c.bf16 %v640_v36, %v640_v36  ;;  %v989_v39 = vpack.c.bf16 %v957_v37, %v957_v37 }
 0x167   : > { %705 = vst.msk [vmem:[#allocation2 + $0x58] sm:$0xf] %vm682_vm0, %v672_v38  ;;  %1057 = vrot.lane.b32.xlu2 %v989_v39, %s3103_s26  ;;  %v777_v48 = vunpack.c.l.b16 %v672_v38 }
 0x168   : > { %v595_v40 = vpop.f32.mrf.mxu0  ;;  %v885_v41 = vpop.f32.mrf.mxu1 }
 0x169   : > { %v596_v42 = vadd.f32 %v3251_v18, %v595_v40  ;;  %v886_v43 = vadd.f32 %v3315_v7, %v885_v41 }
 0x16b   : > { %v641_v44 = vmax.f32 %v596_v42, 0.0  ;;  %v958_v45 = vmax.f32 %v886_v43, 0.0 }
 0x16d   : > { %v673_v46 = vpack.c.bf16 %v641_v44, %v641_v44  ;;  %v990_v47 = vpack.c.bf16 %v958_v45, %v958_v45 }
 0x16f   : > { %706 = vst.msk [vmem:[#allocation2 + $0x5c] sm:$0xf] %vm682_vm0, %v673_v46  ;;  %v778_v49 = vunpack.c.l.b16 %v673_v46  ;;  %1059 = vrot.lane.b32.xlu2 %v990_v47, %s3103_s26 }
 0x170   : > { %v598_v50 = vpop.f32.mrf.mxu0  ;;  %v3336_v51 = vpop.f32.mrf.mxu1 }
 0x171   : > { %v599_v52 = vadd.f32 %v3251_v18, %v598_v50  ;;  %v798_v53 = vpack.c.b16 %v778_v49, %v777_v48 }
 0x173   : > { %v642_v54 = vmax.f32 %v599_v52, 0.0  ;;  %2605 = vmatmul.msk.bf16.vlgmr.msra.gmra.mxu3 %vm815_vm1, %v798_v53 }
 0x175   : > { %v674_v55 = vpack.c.bf16 %v642_v54, %v642_v54 }
 0x177   : > { %707 = vst.msk [vmem:[#allocation2 + $0x60] sm:$0xf] %vm682_vm0, %v674_v55  ;;  %v779_v0 = vunpack.c.l.b16 %v674_v55 }
 0x178   : > { %v600_v56 = vpop.f32.mrf.mxu0  ;;  %v890_v57 = vpop.f32.mrf.mxu1 }
 0x179   : > { %v601_v58 = vadd.f32 %v3251_v18, %v600_v56  ;;  %v891_v59 = vadd.f32 %v3315_v7, %v890_v57 }
 0x17b   : > { %v643_v60 = vmax.f32 %v601_v58, 0.0  ;;  %v960_v61 = vmax.f32 %v891_v59, 0.0 }
 0x17d   : > { %v675_v62 = vpack.c.bf16 %v643_v60, %v643_v60  ;;  %v992_v63 = vpack.c.bf16 %v960_v61, %v960_v61 }
 0x17f   : > { %708 = vst.msk [vmem:[#allocation2 + $0x64] sm:$0xf] %vm682_vm0, %v675_v62  ;;  %v780_v1 = vunpack.c.l.b16 %v675_v62  ;;  %1063 = vrot.lane.b32.xlu1 %v992_v63, %s3103_s26 }
 0x180   : > { %v603_v2 = vpop.f32.mrf.mxu0  ;;  %v893_v32 = vpop.f32.mrf.mxu1 }
 0x181   : > { %v604_v3 = vadd.f32 %v3251_v18, %v603_v2  ;;  %v894_v4 = vadd.f32 %v3315_v7, %v893_v32  ;;  %v799_v5 = vpack.c.b16 %v780_v1, %v779_v0  ;;  %v889_v32 = vadd.f32 %v3315_v7, %v3336_v51 }
 0x183   : > { %v644_v6 = vmax.f32 %v604_v3, 0.0  ;;  %v961_v8 = vmax.f32 %v894_v4, 0.0  ;;  %2606 = vmatmul.msk.bf16.gmra.mxu3 %vm815_vm1, %v799_v5  ;;  %v959_v5 = vmax.f32 %v889_v32, 0.0 }
 0x185   : > { %v676_v9 = vpack.c.bf16 %v644_v6, %v644_v6  ;;  %v993_v10 = vpack.c.bf16 %v961_v8, %v961_v8  ;;  %v991_v8 = vpack.c.bf16 %v959_v5, %v959_v5 }
 0x187   : > { %709 = vst.msk [vmem:[#allocation2 + $0x68] sm:$0xf] %vm682_vm0, %v676_v9  ;;  %1065 = vrot.lane.b32.xlu2 %v993_v10, %s3103_s26  ;;  %v781_v16 = vunpack.c.l.b16 %v676_v9 }
 0x188   : > { %v605_v11 = vpop.f32.mrf.mxu0  ;;  %v3350_v12 = vpop.f32.mrf.mxu1 }
 0x189   : > { %v606_v13 = vadd.f32 %v3251_v18, %v605_v11  ;;  %v896_v9 = vadd.f32 %v3315_v7, %v3350_v12 }
 0x18b   : > { %v645_v14 = vmax.f32 %v606_v13, 0.0  ;;  %v962_v51 = vmax.f32 %v896_v9, 0.0 }
 0x18d   : > { %v677_v15 = vpack.c.bf16 %v645_v14, %v645_v14 }
 0x18f   : > { %710 = vst.msk [vmem:[#allocation2 + $0x6c] sm:$0xf] %vm682_vm0, %v677_v15  ;;  %v782_v17 = vunpack.c.l.b16 %v677_v15 }
 0x190   : > { %v608_v19 = vpop.f32.mrf.mxu0  ;;  %v898_v20 = vpop.f32.mrf.mxu1 }
 0x191   : > { %v609_v21 = vadd.f32 %v3251_v18, %v608_v19  ;;  %v899_v22 = vadd.f32 %v3315_v7, %v898_v20  ;;  %v800_v23 = vpack.c.b16 %v782_v17, %v781_v16  ;;  %v2946_v17 = vld [vmem:[%s3755_s5 + $0x18] sm:$0xff]  ;;  %v994_v19 = vpack.c.bf16 %v962_v51, %v962_v51 }
 0x192   : > { %1379 = vmatpush.bf16.msrb.mxu2 %v2946_v17 }
 0x193   : > { %v646_v24 = vmax.f32 %v609_v21, 0.0  ;;  %v963_v25 = vmax.f32 %v899_v22, 0.0  ;;  %2607 = vmatmul.msk.bf16.gmra.mxu3 %vm815_vm1, %v800_v23 }
 0x195   : > { %v678_v26 = vpack.c.bf16 %v646_v24, %v646_v24  ;;  %v995_v27 = vpack.c.bf16 %v963_v25, %v963_v25 }
 0x197   : > { %711 = vst.msk [vmem:[#allocation2 + $0x70] sm:$0xf] %vm682_vm0, %v678_v26  ;;  %1069 = vrot.lane.b32.xlu1 %v995_v27, %s3103_s26  ;;  %v783_v37 = vunpack.c.l.b16 %v678_v26 }
 0x198   : > { %v610_v28 = vpop.f32.mrf.mxu0  ;;  %v900_v29 = vpop.f32.mrf.mxu1 }
 0x199   : > { %v611_v30 = vadd.f32 %v3251_v18, %v610_v28  ;;  %v901_v31 = vadd.f32 %v3315_v7, %v900_v29 }
 0x19b   : > { %v647_v33 = vmax.f32 %v611_v30, 0.0  ;;  %v964_v34 = vmax.f32 %v901_v31, 0.0 }
 0x19d   : > { %v679_v35 = vpack.c.bf16 %v647_v33, %v647_v33  ;;  %v996_v36 = vpack.c.bf16 %v964_v34, %v964_v34 }
 0x19f   : > { %712 = vst.msk [vmem:[#allocation2 + $0x74] sm:$0xf] %vm682_vm0, %v679_v35  ;;  %v784_v38 = vunpack.c.l.b16 %v679_v35  ;;  %1071 = vrot.lane.b32.xlu2 %v996_v36, %s3103_s26 }
 0x1a0   : > { %v613_v39 = vpop.f32.mrf.mxu0 }
 0x1a1   : > { %v614_v40 = vadd.f32 %v3251_v18, %v613_v39  ;;  %v801_v41 = vpack.c.b16 %v784_v38, %v783_v37  ;;  %v2945_v39 = vld [vmem:[%s3755_s5 + $0x10] sm:$0xff] }
 0x1a2   : > { %1380 = vmatpush.bf16.msrb.mxu2 %v2945_v39 }
 0x1a3   : > { %v648_v42 = vmax.f32 %v614_v40, 0.0  ;;  %2608 = vmatmul.msk.bf16.gmra.mxu3 %vm815_vm1, %v801_v41 }
 0x1a5   : > { %v680_v43 = vpack.c.bf16 %v648_v42, %v648_v42 }
 0x1a6   : > { %v903_v44 = vpop.f32.mrf.mxu2 }
 0x1a7   : > { %713 = vst.msk [vmem:[#allocation2 + $0x78] sm:$0xf] %vm682_vm0, %v680_v43  ;;  %v785_v50 = vunpack.c.l.b16 %v680_v43  ;;  %v904_v12 = vadd.f32 %v3315_v7, %v903_v44 }
 0x1a8   : > { %v615_v45 = vpop.f32.mrf.mxu0 }
 0x1a9   : > { %v616_v46 = vadd.f32 %v3251_v18, %v615_v45  ;;  %v965_v22 = vmax.f32 %v904_v12, 0.0 }
 0x1ab   : > { %v649_v47 = vmax.f32 %v616_v46, 0.0  ;;  %v997_v26 = vpack.c.bf16 %v965_v22, %v965_v22 }
 0x1ad   : > { %v681_v48 = vpack.c.bf16 %v649_v47, %v649_v47 }
 0x1ae   : > { %v905_v49 = vpop.f32.mrf.mxu2 }
 0x1af   : > { %714 = vst.msk [vmem:[#allocation2 + $0x7c] sm:$0xf] %vm682_vm0, %v681_v48  ;;  %v786_v52 = vunpack.c.l.b16 %v681_v48  ;;  %v906_v53 = vadd.f32 %v3315_v7, %v905_v49 }
 0x1b0   : > { %v873_v54 = vpop.f32.mrf.mxu0 }
 0x1b1   : > { %v966_v55 = vmax.f32 %v906_v53, 0.0  ;;  %v874_v56 = vadd.f32 %v3315_v7, %v873_v54  ;;  %v802_v57 = vpack.c.b16 %v786_v52, %v785_v50  ;;  %v2944_v50 = vld [vmem:[%s3755_s5 + $0x8] sm:$0xff] }
 0x1b2   : > { %1381 = vmatpush.bf16.msrb.mxu2 %v2944_v50 }
 0x1b3   : > { %v998_v58 = vpack.c.bf16 %v966_v55, %v966_v55  ;;  %v953_v59 = vmax.f32 %v874_v56, 0.0  ;;  %2609 = vmatmul.msk.bf16.gmra.mxu3 %vm815_vm1, %v802_v57 }
 0x1b5   : > { %1075 = vrot.lane.b32.xlu1 %v998_v58, %s3103_s26  ;;  %v985_v18 = vpack.c.bf16 %v953_v59, %v953_v59 }
 0x1b6   : > { %v908_v60 = vpop.f32.mrf.mxu2 }
 0x1b7   : > { %v909_v61 = vadd.f32 %v3315_v7, %v908_v60  ;;  %1049 = vrot.lane.b32.xlu0 %v985_v18, %s3103_s26 }
 0x1b8   : > { %v875_v62 = vpop.f32.mrf.mxu0 }
 0x1b9   : > { %v967_v63 = vmax.f32 %v909_v61, 0.0  ;;  %v876_v0 = vadd.f32 %v3315_v7, %v875_v62 }
 0x1bb   : > { %v999_v1 = vpack.c.bf16 %v967_v63, %v967_v63  ;;  %v954_v2 = vmax.f32 %v876_v0, 0.0 }
 0x1bd   : > { %v986_v3 = vpack.c.bf16 %v954_v2, %v954_v2  ;;  %1077 = vrot.lane.b32.xlu2 %v999_v1, %s3103_s26  ;;  %v2943_v1 = vld [vmem:[%s3755_s5] sm:$0xff] }
 0x1be   : > { %v910_v4 = vpop.f32.mrf.mxu2  ;;  %1382 = vmatpush.bf16.msrb.mxu2 %v2943_v1 }
 0x1bf   : > { %1051 = vrot.lane.b32.xlu0 %v986_v3, %s3103_s26  ;;  %v911_v27 = vadd.f32 %v3315_v7, %v910_v4 }
 0x1c1   : > { %v1058_v6 = vpop.permute.xlu2 %1057  ;;  %v968_v29 = vmax.f32 %v911_v27, 0.0 }
 0x1c2   : > { %1150 = vst.msk [vmem:[#allocation2 + $0x10] sm:$0xf] %vm1145_vm2, %v1058_v6 }
 0x1c3   : > { %v1000_v30 = vpack.c.bf16 %v968_v29, %v968_v29 }
 0x1c6   : > { %v913_v10 = vpop.f32.mrf.mxu2 }
 0x1c7   : > { %v914_v11 = vadd.f32 %v3315_v7, %v913_v10  ;;  %1061 = vrot.lane.b32.xlu0 %v991_v8, %s3103_s26 }
 0x1c9   : > { %v969_v13 = vmax.f32 %v914_v11, 0.0  ;;  %v1060_v14 = vpop.permute.xlu2 %1059  ;;  %v1054_v15 = vpop.permute.xlu1 %1053 }
 0x1ca   : > { %1151 = vst.msk [vmem:[#allocation2 + $0x14] sm:$0xf] %vm1145_vm2, %v1060_v14 }
 0x1cb   : > { %v1001_v16 = vpack.c.bf16 %v969_v13, %v969_v13  ;;  %1148 = vst.msk [vmem:[#allocation2 + $0x8] sm:$0xf] %vm1145_vm2, %v1054_v15 }
 0x1cd   : > { %1081 = vrot.lane.b32.xlu1 %v1001_v16, %s3103_s26 }
 0x1ce   : > { %v915_v20 = vpop.f32.mrf.mxu2 }
 0x1cf   : > { %v916_v21 = vadd.f32 %v3315_v7, %v915_v20  ;;  %1067 = vrot.lane.b32.xlu0 %v994_v19, %s3103_s26 }
 0x1d1   : > { %v970_v23 = vmax.f32 %v916_v21, 0.0  ;;  %v1056_v24 = vpop.permute.xlu1 %1055 }
 0x1d2   : > { %1149 = vst.msk [vmem:[#allocation2 + $0xc] sm:$0xf] %vm1145_vm2, %v1056_v24 }
 0x1d3   : > { %v1002_v25 = vpack.c.bf16 %v970_v23, %v970_v23 }
 0x1d5   : > { %1083 = vrot.lane.b32.xlu2 %v1002_v25, %s3103_s26 }
 0x1d6   : > { %v918_v28 = vpop.f32.mrf.mxu2 }
 0x1d7   : > { %1073 = vrot.lane.b32.xlu0 %v997_v26, %s3103_s26  ;;  %v919_v31 = vadd.f32 %v3315_v7, %v918_v28 }
 0x1d9   : > { %v971_v35 = vmax.f32 %v919_v31, 0.0 }
 0x1db   : > { %v1003_v40 = vpack.c.bf16 %v971_v35, %v971_v35 }
 0x1de   : > { %v920_v33 = vpop.f32.mrf.mxu2 }
 0x1df   : > { %v921_v34 = vadd.f32 %v3315_v7, %v920_v33  ;;  %1079 = vrot.lane.b32.xlu0 %v1000_v30, %s3103_s26 }
 0x1e1   : > { %v972_v36 = vmax.f32 %v921_v34, 0.0  ;;  %v1066_v37 = vpop.permute.xlu2 %1065 }
 0x1e2   : > { %1154 = vst.msk [vmem:[#allocation2 + $0x20] sm:$0xf] %vm1145_vm2, %v1066_v37 }
 0x1e3   : > { %v1004_v38 = vpack.c.bf16 %v972_v36, %v972_v36 }
 0x1e5   : > { %1087 = vrot.lane.b32.xlu1 %v1004_v38, %s3103_s26 }
 0x1e6   : > { %v923_v41 = vpop.f32.mrf.mxu2 }
 0x1e7   : > { %v924_v42 = vadd.f32 %v3315_v7, %v923_v41  ;;  %1085 = vrot.lane.b32.xlu0 %v1003_v40, %s3103_s26 }
 0x1e9   : > { %v973_v43 = vmax.f32 %v924_v42, 0.0  ;;  %v2928_v42 = vld [vmem:[#allocation2 + $0x8] sm:$0xff] }
 0x1eb   : > { %v1005_v44 = vpack.c.bf16 %v973_v43, %v973_v43 }
 0x1ed   : > { %1089 = vrot.lane.b32.xlu2 %v1005_v44, %s3103_s26 }
 0x1ee   : > { %v925_v45 = vpop.f32.mrf.mxu2 }
 0x1ef   : > { %v926_v46 = vadd.f32 %v3315_v7, %v925_v45  ;;  %v2929_v45 = vld [vmem:[#allocation2 + $0x10] sm:$0xff] }
 0x1f1   : > { %v974_v47 = vmax.f32 %v926_v46, 0.0  ;;  %v1064_v48 = vpop.permute.xlu1 %1063 }
 0x1f2   : > { %1153 = vst.msk [vmem:[#allocation2 + $0x1c] sm:$0xf] %vm1145_vm2, %v1064_v48  ;;  %v2966_v48 = vld [vmem:[%s3755_s5 + $0x38] sm:$0xff] }
 0x1f3   : > { %v1006_v49 = vpack.c.bf16 %v974_v47, %v974_v47  ;;  %1762 = vmatpush.bf16.msrb.mxu3 %v2966_v48 }
 0x1f5   : > { %1091 = vrot.lane.b32.xlu0 %v1006_v49, %s3103_s26 }
 0x1f6   : > { %v928_v52 = vpop.f32.mrf.mxu3 }
 0x1f7   : > { %v929_v53 = vadd.f32 %v3315_v7, %v928_v52 }
 0x1f9   : > { %v975_v54 = vmax.f32 %v929_v53, 0.0  ;;  %v1072_v55 = vpop.permute.xlu2 %1071 }
 0x1fa   : > { %1157 = vst.msk [vmem:[#allocation2 + $0x2c] sm:$0xf] %vm1145_vm2, %v1072_v55 }
 0x1fb   : > { %v1007_v56 = vpack.c.bf16 %v975_v54, %v975_v54  ;;  %v2965_v54 = vld [vmem:[%s3755_s5 + $0x30] sm:$0xff] }
 0x1fc   : > { %1763 = vmatpush.bf16.msrb.mxu3 %v2965_v54 }
 0x1fd   : > { %1093 = vrot.lane.b32.xlu1 %v1007_v56, %s3103_s26 }
 0x1fe   : > { %v930_v57 = vpop.f32.mrf.mxu3 }
 0x1ff   : > { %v931_v58 = vadd.f32 %v3315_v7, %v930_v57 }
 0x201   : > { %v976_v59 = vmax.f32 %v931_v58, 0.0 }
 0x203   : > { %v1008_v18 = vpack.c.bf16 %v976_v59, %v976_v59  ;;  %v2964_v59 = vld [vmem:[%s3755_s5 + $0x28] sm:$0xff] }
 0x204   : > { %1764 = vmatpush.bf16.msrb.mxu3 %v2964_v59 }
 0x205   : > { %1095 = vrot.lane.b32.xlu2 %v1008_v18, %s3103_s26 }
 0x206   : > { %v933_v60 = vpop.f32.mrf.mxu3 }
 0x207   : > { %v934_v61 = vadd.f32 %v3315_v7, %v933_v60 }
 0x209   : > { %v977_v62 = vmax.f32 %v934_v61, 0.0  ;;  %v1070_v63 = vpop.permute.xlu1 %1069 }
 0x20a   : > { %1156 = vst.msk [vmem:[#allocation2 + $0x28] sm:$0xf] %vm1145_vm2, %v1070_v63 }
 0x20b   : > { %v1009_v0 = vpack.c.bf16 %v977_v62, %v977_v62  ;;  %v2963_v62 = vld [vmem:[%s3755_s5 + $0x20] sm:$0xff] }
 0x20c   : > { %1765 = vmatpush.bf16.msrb.mxu3 %v2963_v62 }
 0x20d   : > { %1097 = vrot.lane.b32.xlu0 %v1009_v0, %s3103_s26 }
 0x20e   : > { %v935_v2 = vpop.f32.mrf.mxu3 }
 0x20f   : > { %v936_v32 = vadd.f32 %v3315_v7, %v935_v2 }
 0x211   : > { %v978_v3 = vmax.f32 %v936_v32, 0.0  ;;  %v2932_v57 = vld [vmem:[#allocation2 + $0x28] sm:$0xff]  ;;  %v3487_v32 = vld [vmem:[%s3756_s6] ss:$0 sm:$0xff] }
 0x213   : > { %v1010_v4 = vpack.c.bf16 %v978_v3, %v978_v3 }
 0x215   : > { %1099 = vrot.lane.b32.xlu1 %v1010_v4, %s3103_s26 }
 0x216   : > { %v938_v5 = vpop.f32.mrf.mxu3 }
 0x217   : > { %v939_v6 = vadd.f32 %v3315_v7, %v938_v5  ;;  %v1078_v8 = vpop.permute.xlu2 %1077 }
 0x218   : > { %1160 = vst.msk [vmem:[#allocation2 + $0x38] sm:$0xf] %vm1145_vm2, %v1078_v8 }
 0x219   : > { %v979_v9 = vmax.f32 %v939_v6, 0.0 }
 0x21b   : > { %v1011_v10 = vpack.c.bf16 %v979_v9, %v979_v9 }
 0x21d   : > { %1101 = vrot.lane.b32.xlu2 %v1011_v10, %s3103_s26 }
 0x21e   : > { %v940_v11 = vpop.f32.mrf.mxu3 }
 0x21f   : > { %v941_v51 = vadd.f32 %v3315_v7, %v940_v11 }
 0x221   : > { %v980_v13 = vmax.f32 %v941_v51, 0.0 }
 0x223   : > { %v1012_v14 = vpack.c.bf16 %v980_v13, %v980_v13 }
 0x225   : > { %1103 = vrot.lane.b32.xlu0 %v1012_v14, %s3103_s26 }
 0x226   : > { %v943_v15 = vpop.f32.mrf.mxu3 }
 0x227   : > { %v944_v16 = vadd.f32 %v3315_v7, %v943_v15  ;;  %v1076_v17 = vpop.permute.xlu1 %1075 }
 0x228   : > { %1159 = vst.msk [vmem:[#allocation2 + $0x34] sm:$0xf] %vm1145_vm2, %v1076_v17 }
 0x229   : > { %v981_v19 = vmax.f32 %v944_v16, 0.0  ;;  %v1050_v12 = vpop.permute.xlu0 %1049 }
 0x22a   : > { %1146 = vst.msk [vmem:[#allocation2] sm:$0xf] %vm1145_vm2, %v1050_v12 }
 0x22b   : > { %v1013_v20 = vpack.c.bf16 %v981_v19, %v981_v19 }
 0x22d   : > { %1105 = vrot.lane.b32.xlu1 %v1013_v20, %s3103_s26 }
 0x22e   : > { %v945_v21 = vpop.f32.mrf.mxu3 }
 0x22f   : > { %v946_v22 = vadd.f32 %v3315_v7, %v945_v21  ;;  %v1084_v23 = vpop.permute.xlu2 %1083 }
 0x230   : > { %1163 = vst.msk [vmem:[#allocation2 + $0x44] sm:$0xf] %vm1145_vm2, %v1084_v23 }
 0x231   : > { %v982_v24 = vmax.f32 %v946_v22, 0.0  ;;  %v1052_v25 = vpop.permute.xlu0 %1051 }
 0x232   : > { %1147 = vst.msk [vmem:[#allocation2 + $0x4] sm:$0xf] %vm1145_vm2, %v1052_v25 }
 0x233   : > { %v1014_v26 = vpack.c.bf16 %v982_v24, %v982_v24 }
 0x235   : > { %1107 = vrot.lane.b32.xlu2 %v1014_v26, %s3103_s26 }
 0x236   : > { %v948_v27 = vpop.f32.mrf.mxu3 }
 0x237   : > { %v949_v28 = vadd.f32 %v3315_v7, %v948_v27 }
 0x239   : > { %v983_v29 = vmax.f32 %v949_v28, 0.0  ;;  %v1062_v30 = vpop.permute.xlu0 %1061  ;;  %v2927_v31 = vld [vmem:[#allocation2] sm:$0xff] }
 0x23a   : > { %1152 = vst.msk [vmem:[#allocation2 + $0x18] sm:$0xf] %vm1145_vm2, %v1062_v30  ;;  %2690 = vmatmul.msk.bf16.vlgmr.msrb.gmra.mxu2 %vm1326_vm3, %v2927_v31 }
 0x23b   : > { %v1015_v33 = vpack.c.bf16 %v983_v29, %v983_v29 }
 0x23d   : > { %1109 = vrot.lane.b32.xlu0 %v1015_v33, %s3103_s26 }
 0x23e   : > { %v950_v34 = vpop.f32.mrf.mxu3 }
 0x23f   : > { %v951_v35 = vadd.f32 %v3315_v7, %v950_v34  ;;  %v1082_v36 = vpop.permute.xlu1 %1081 }
 0x240   : > { %1162 = vst.msk [vmem:[#allocation2 + $0x40] sm:$0xf] %vm1145_vm2, %v1082_v36 }
 0x241   : > { %v984_v37 = vmax.f32 %v951_v35, 0.0  ;;  %v1068_v38 = vpop.permute.xlu0 %1067  ;;  %v2930_v49 = vld [vmem:[#allocation2 + $0x18] sm:$0xff] }
 0x242   : > { %1155 = vst.msk [vmem:[#allocation2 + $0x24] sm:$0xf] %vm1145_vm2, %v1068_v38 }
 0x243   : > { %v1016_v39 = vpack.c.bf16 %v984_v37, %v984_v37 }
 0x245   : > { %1111 = vrot.lane.b32.xlu1 %v1016_v39, %s3103_s26 }
 0x247   : > { %v1090_v40 = vpop.permute.xlu2 %1089  ;;  %v2935_v2 = vld [vmem:[#allocation2 + $0x40] sm:$0xff] }
 0x248   : > { %1166 = vst.msk [vmem:[#allocation2 + $0x50] sm:$0xf] %vm1145_vm2, %v1090_v40 }
 0x249   : > { %v1074_v41 = vpop.permute.xlu0 %1073  ;;  %v2931_v53 = vld [vmem:[#allocation2 + $0x20] sm:$0xff] }
 0x24a   : > { %1158 = vst.msk [vmem:[#allocation2 + $0x30] sm:$0xf] %vm1145_vm2, %v1074_v41  ;;  %2691 = vmatmul.msk.bf16.gmra.mxu2 %vm1326_vm3, %v2928_v42 }
 0x251   : > { %v1080_v7 = vpop.permute.xlu0 %1079  ;;  %v2933_v60 = vld [vmem:[#allocation2 + $0x30] sm:$0xff] }
 0x252   : > { %1161 = vst.msk [vmem:[#allocation2 + $0x3c] sm:$0xf] %vm1145_vm2, %v1080_v7 }
 0x257   : > { %v1088_v43 = vpop.permute.xlu1 %1087 }
 0x258   : > { %1165 = vst.msk [vmem:[#allocation2 + $0x4c] sm:$0xf] %vm1145_vm2, %v1088_v43 }
 0x259   : > { %v1086_v44 = vpop.permute.xlu0 %1085  ;;  %v2934_v63 = vld [vmem:[#allocation2 + $0x38] sm:$0xff] }
 0x25a   : > { %1164 = vst.msk [vmem:[#allocation2 + $0x48] sm:$0xf] %vm1145_vm2, %v1086_v44  ;;  %2692 = vmatmul.msk.bf16.gmra.mxu2 %vm1326_vm3, %v2929_v45 }
 0x25f   : > { %v1096_v46 = vpop.permute.xlu2 %1095 }
 0x260   : > { %1169 = vst.msk [vmem:[#allocation2 + $0x5c] sm:$0xf] %vm1145_vm2, %v1096_v46 }
 0x261   : > { %v2936_v11 = vld [vmem:[#allocation2 + $0x48] sm:$0xff] }
 0x267   : > { %v1092_v47 = vpop.permute.xlu0 %1091 }
 0x268   : > { %1167 = vst.msk [vmem:[#allocation2 + $0x54] sm:$0xf] %vm1145_vm2, %v1092_v47 }
 0x26a   : > { %2693 = vmatmul.msk.bf16.gmra.mxu2 %vm1326_vm3, %v2930_v49 }
 0x26f   : > { %v1094_v50 = vpop.permute.xlu1 %1093  ;;  %v2937_v21 = vld [vmem:[#allocation2 + $0x50] sm:$0xff] }
 0x270   : > { %1168 = vst.msk [vmem:[#allocation2 + $0x58] sm:$0xf] %vm1145_vm2, %v1094_v50 }
 0x277   : > { %v1102_v52 = vpop.permute.xlu2 %1101  ;;  %v2938_v31 = vld [vmem:[#allocation2 + $0x58] sm:$0xff] }
 0x278   : > { %1172 = vst.msk [vmem:[#allocation2 + $0x68] sm:$0xf] %vm1145_vm2, %v1102_v52 }
 0x27a   : > { %2694 = vmatmul.msk.bf16.gmra.mxu2 %vm1326_vm3, %v2931_v53 }
 0x27f   : > { %v1098_v55 = vpop.permute.xlu0 %1097 }
 0x280   : > { %1170 = vst.msk [vmem:[#allocation2 + $0x60] sm:$0xf] %vm1145_vm2, %v1098_v55 }
 0x287   : > { %v1100_v56 = vpop.permute.xlu1 %1099 }
 0x288   : > { %1171 = vst.msk [vmem:[#allocation2 + $0x64] sm:$0xf] %vm1145_vm2, %v1100_v56 }
 0x28a   : > { %2695 = vmatmul.msk.bf16.gmra.mxu2 %vm1326_vm3, %v2932_v57 }
 0x28f   : > { %v1108_v58 = vpop.permute.xlu2 %1107  ;;  %v2939_v42 = vld [vmem:[#allocation2 + $0x60] sm:$0xff] }
 0x290   : > { %1175 = vst.msk [vmem:[#allocation2 + $0x74] sm:$0xf] %vm1145_vm2, %v1108_v58 }
 0x297   : > { %v1104_v18 = vpop.permute.xlu0 %1103 }
 0x298   : > { %1173 = vst.msk [vmem:[#allocation2 + $0x6c] sm:$0xf] %vm1145_vm2, %v1104_v18 }
 0x29a   : > { %2696 = vmatmul.msk.bf16.gmra.mxu2 %vm1326_vm3, %v2933_v60 }
 0x29f   : > { %v1106_v61 = vpop.permute.xlu1 %1105  ;;  %v2940_v52 = vld [vmem:[#allocation2 + $0x68] sm:$0xff] }
 0x2a0   : > { %1174 = vst.msk [vmem:[#allocation2 + $0x70] sm:$0xf] %vm1145_vm2, %v1106_v61 }
 0x2a7   : > { %v2941_v61 = vld [vmem:[#allocation2 + $0x70] sm:$0xff] }
 0x2aa   : > { %2697 = vmatmul.msk.bf16.gmra.mxu2 %vm1326_vm3, %v2934_v63 }
 0x2af   : > { %v1110_v0 = vpop.permute.xlu0 %1109 }
 0x2b0   : > { %1176 = vst.msk [vmem:[#allocation2 + $0x78] sm:$0xf] %vm1145_vm2, %v1110_v0 }
 0x2b7   : > { %v1112_v1 = vpop.permute.xlu1 %1111 }
 0x2b8   : > { %1177 = vst.msk [vmem:[#allocation2 + $0x7c] sm:$0xf] %vm1145_vm2, %v1112_v1 }
 0x2ba   : > { %2698 = vmatmul.msk.bf16.gmra.mxu2 %vm1326_vm3, %v2935_v2 }
 0x2bd   : > { %v1384_v3 = vpop.f32.mrf.mxu2 }
 0x2be   : > { %v1385_v4 = vadd.f32 %v3487_v32, %v1384_v3 }
 0x2c0   : > { %v1464_v5 = vmax.f32 %v1385_v4, 0.0 }
 0x2c2   : > { %v1496_v6 = vpack.c.bf16 %v1464_v5, %v1464_v5 }
 0x2c4   : > { %1528 = vst.msk [vmem:[#allocation2] sm:$0xf] %vm682_vm0, %v1496_v6 }
 0x2c5   : > { %v1386_v8 = vpop.f32.mrf.mxu2 }
 0x2c6   : > { %v1387_v9 = vadd.f32 %v3487_v32, %v1386_v8  ;;  %v2942_v8 = vld [vmem:[#allocation2 + $0x78] sm:$0xff] }
 0x2c8   : > { %v1465_v10 = vmax.f32 %v1387_v9, 0.0 }
 0x2ca   : > { %v1497_v51 = vpack.c.bf16 %v1465_v10, %v1465_v10  ;;  %2699 = vmatmul.msk.bf16.gmra.mxu2 %vm1326_vm3, %v2936_v11 }
 0x2cc   : > { %1529 = vst.msk [vmem:[#allocation2 + $0x4] sm:$0xf] %vm682_vm0, %v1497_v51 }
 0x2cd   : > { %v1389_v13 = vpop.f32.mrf.mxu2 }
 0x2ce   : > { %v1390_v14 = vadd.f32 %v3487_v32, %v1389_v13 }
 0x2d0   : > { %v1466_v15 = vmax.f32 %v1390_v14, 0.0 }
 0x2d2   : > { %v1498_v16 = vpack.c.bf16 %v1466_v15, %v1466_v15 }
 0x2d3   : > { %v2947_v17 = vld [vmem:[#allocation2] sm:$0xff] }
 0x2d4   : > { %1530 = vst.msk [vmem:[#allocation2 + $0x8] sm:$0xf] %vm682_vm0, %v1498_v16  ;;  %2795 = vmatmul.msk.bf16.vlgmr.msrb.gmra.mxu3 %vm1326_vm3, %v2947_v17 }
 0x2d5   : > { %v1391_v19 = vpop.f32.mrf.mxu2 }
 0x2d6   : > { %v1392_v12 = vadd.f32 %v3487_v32, %v1391_v19 }
 0x2d8   : > { %v1467_v20 = vmax.f32 %v1392_v12, 0.0 }
 0x2da   : > { %v1499_v22 = vpack.c.bf16 %v1467_v20, %v1467_v20  ;;  %2700 = vmatmul.msk.bf16.gmra.mxu2 %vm1326_vm3, %v2937_v21 }
 0x2dc   : > { %1531 = vst.msk [vmem:[#allocation2 + $0xc] sm:$0xf] %vm682_vm0, %v1499_v22 }
 0x2dd   : > { %v1394_v23 = vpop.f32.mrf.mxu2 }
 0x2de   : > { %v1395_v24 = vadd.f32 %v3487_v32, %v1394_v23 }
 0x2e0   : > { %v1468_v25 = vmax.f32 %v1395_v24, 0.0 }
 0x2e2   : > { %v1500_v26 = vpack.c.bf16 %v1468_v25, %v1468_v25 }
 0x2e3   : > { %v2948_v27 = vld [vmem:[#allocation2 + $0x8] sm:$0xff] }
 0x2e4   : > { %1532 = vst.msk [vmem:[#allocation2 + $0x10] sm:$0xf] %vm682_vm0, %v1500_v26  ;;  %2796 = vmatmul.msk.bf16.gmra.mxu3 %vm1326_vm3, %v2948_v27 }
 0x2e5   : > { %v1396_v28 = vpop.f32.mrf.mxu2 }
 0x2e6   : > { %v1397_v29 = vadd.f32 %v3487_v32, %v1396_v28 }
 0x2e8   : > { %v1469_v30 = vmax.f32 %v1397_v29, 0.0 }
 0x2ea   : > { %v1501_v33 = vpack.c.bf16 %v1469_v30, %v1469_v30  ;;  %2701 = vmatmul.msk.bf16.gmra.mxu2 %vm1326_vm3, %v2938_v31 }
 0x2ec   : > { %1533 = vst.msk [vmem:[#allocation2 + $0x14] sm:$0xf] %vm682_vm0, %v1501_v33 }
 0x2ed   : > { %v1399_v34 = vpop.f32.mrf.mxu2 }
 0x2ee   : > { %v1400_v35 = vadd.f32 %v3487_v32, %v1399_v34 }
 0x2f0   : > { %v1470_v36 = vmax.f32 %v1400_v35, 0.0  ;;  %v3546_v35 = vld [vmem:[%s3756_s6 + $0x1] ss:$0 sm:$0xff] }
 0x2f2   : > { %v1502_v37 = vpack.c.bf16 %v1470_v36, %v1470_v36 }
 0x2f3   : > { %v2949_v38 = vld [vmem:[#allocation2 + $0x10] sm:$0xff] }
 0x2f4   : > { %1534 = vst.msk [vmem:[#allocation2 + $0x18] sm:$0xf] %vm682_vm0, %v1502_v37  ;;  %2797 = vmatmul.msk.bf16.gmra.mxu3 %vm1326_vm3, %v2949_v38 }
 0x2f5   : > { %v1401_v39 = vpop.f32.mrf.mxu2 }
 0x2f6   : > { %v1402_v40 = vadd.f32 %v3487_v32, %v1401_v39 }
 0x2f8   : > { %v1471_v41 = vmax.f32 %v1402_v40, 0.0 }
 0x2fa   : > { %v1503_v7 = vpack.c.bf16 %v1471_v41, %v1471_v41  ;;  %2702 = vmatmul.msk.bf16.gmra.mxu2 %vm1326_vm3, %v2939_v42 }
 0x2fc   : > { %1535 = vst.msk [vmem:[#allocation2 + $0x1c] sm:$0xf] %vm682_vm0, %v1503_v7 }
 0x2fd   : > { %v1404_v43 = vpop.f32.mrf.mxu2 }
 0x2fe   : > { %v1405_v44 = vadd.f32 %v3487_v32, %v1404_v43 }
 0x300   : > { %v1472_v45 = vmax.f32 %v1405_v44, 0.0 }
 0x302   : > { %v1504_v46 = vpack.c.bf16 %v1472_v45, %v1472_v45 }
 0x303   : > { %v2950_v47 = vld [vmem:[#allocation2 + $0x18] sm:$0xff] }
 0x304   : > { %1536 = vst.msk [vmem:[#allocation2 + $0x20] sm:$0xf] %vm682_vm0, %v1504_v46  ;;  %2798 = vmatmul.msk.bf16.gmra.mxu3 %vm1326_vm3, %v2950_v47 }
 0x305   : > { %v1406_v48 = vpop.f32.mrf.mxu2 }
 0x306   : > { %v1407_v49 = vadd.f32 %v3487_v32, %v1406_v48 }
 0x308   : > { %v1473_v50 = vmax.f32 %v1407_v49, 0.0 }
 0x30a   : > { %v1505_v53 = vpack.c.bf16 %v1473_v50, %v1473_v50  ;;  %2703 = vmatmul.msk.bf16.gmra.mxu2 %vm1326_vm3, %v2940_v52 }
 0x30c   : > { %1537 = vst.msk [vmem:[#allocation2 + $0x24] sm:$0xf] %vm682_vm0, %v1505_v53 }
 0x30d   : > { %v1409_v54 = vpop.f32.mrf.mxu2 }
 0x30e   : > { %v1410_v55 = vadd.f32 %v3487_v32, %v1409_v54 }
 0x310   : > { %v1474_v56 = vmax.f32 %v1410_v55, 0.0 }
 0x312   : > { %v1506_v57 = vpack.c.bf16 %v1474_v56, %v1474_v56 }
 0x313   : > { %v2951_v58 = vld [vmem:[#allocation2 + $0x20] sm:$0xff] }
 0x314   : > { %1538 = vst.msk [vmem:[#allocation2 + $0x28] sm:$0xf] %vm682_vm0, %v1506_v57  ;;  %2799 = vmatmul.msk.bf16.gmra.mxu3 %vm1326_vm3, %v2951_v58 }
 0x315   : > { %v1411_v59 = vpop.f32.mrf.mxu2 }
 0x316   : > { %v1412_v18 = vadd.f32 %v3487_v32, %v1411_v59 }
 0x318   : > { %v1475_v60 = vmax.f32 %v1412_v18, 0.0 }
 0x31a   : > { %v1507_v62 = vpack.c.bf16 %v1475_v60, %v1475_v60  ;;  %2704 = vmatmul.msk.bf16.gmra.mxu2 %vm1326_vm3, %v2941_v61 }
 0x31c   : > { %1539 = vst.msk [vmem:[#allocation2 + $0x2c] sm:$0xf] %vm682_vm0, %v1507_v62 }
 0x31d   : > { %v1414_v63 = vpop.f32.mrf.mxu2 }
 0x31e   : > { %v1415_v0 = vadd.f32 %v3487_v32, %v1414_v63 }
 0x320   : > { %v1476_v1 = vmax.f32 %v1415_v0, 0.0 }
 0x322   : > { %v1508_v2 = vpack.c.bf16 %v1476_v1, %v1476_v1 }
 0x323   : > { %v2952_v3 = vld [vmem:[#allocation2 + $0x28] sm:$0xff] }
 0x324   : > { %1540 = vst.msk [vmem:[#allocation2 + $0x30] sm:$0xf] %vm682_vm0, %v1508_v2  ;;  %2800 = vmatmul.msk.bf16.gmra.mxu3 %vm1326_vm3, %v2952_v3 }
 0x325   : > { %v1416_v4 = vpop.f32.mrf.mxu2 }
 0x326   : > { %v1417_v5 = vadd.f32 %v3487_v32, %v1416_v4 }
 0x328   : > { %v1477_v6 = vmax.f32 %v1417_v5, 0.0 }
 0x32a   : > { %v1509_v9 = vpack.c.bf16 %v1477_v6, %v1477_v6  ;;  %2705 = vmatmul.msk.bf16.gmra.mxu2 %vm1326_vm3, %v2942_v8 }
 0x32c   : > { %1541 = vst.msk [vmem:[#allocation2 + $0x34] sm:$0xf] %vm682_vm0, %v1509_v9 }
 0x32d   : > { %v1419_v10 = vpop.f32.mrf.mxu2 }
 0x32e   : > { %v1420_v11 = vadd.f32 %v3487_v32, %v1419_v10 }
 0x330   : > { %v1478_v51 = vmax.f32 %v1420_v11, 0.0 }
 0x332   : > { %v1510_v13 = vpack.c.bf16 %v1478_v51, %v1478_v51 }
 0x333   : > { %v2953_v14 = vld [vmem:[#allocation2 + $0x30] sm:$0xff] }
 0x334   : > { %1542 = vst.msk [vmem:[#allocation2 + $0x38] sm:$0xf] %vm682_vm0, %v1510_v13  ;;  %2801 = vmatmul.msk.bf16.gmra.mxu3 %vm1326_vm3, %v2953_v14 }
 0x335   : > { %v1421_v15 = vpop.f32.mrf.mxu2 }
 0x336   : > { %v1422_v16 = vadd.f32 %v3487_v32, %v1421_v15 }
 0x338   : > { %v1479_v17 = vmax.f32 %v1422_v16, 0.0 }
 0x33a   : > { %v1511_v19 = vpack.c.bf16 %v1479_v17, %v1479_v17 }
 0x33c   : > { %1543 = vst.msk [vmem:[#allocation2 + $0x3c] sm:$0xf] %vm682_vm0, %v1511_v19 }
 0x33d   : > { %v1424_v12 = vpop.f32.mrf.mxu2 }
 0x33e   : > { %v1425_v20 = vadd.f32 %v3487_v32, %v1424_v12 }
 0x340   : > { %v1480_v21 = vmax.f32 %v1425_v20, 0.0 }
 0x342   : > { %v1512_v22 = vpack.c.bf16 %v1480_v21, %v1480_v21 }
 0x343   : > { %v2954_v23 = vld [vmem:[#allocation2 + $0x38] sm:$0xff] }
 0x344   : > { %1544 = vst.msk [vmem:[#allocation2 + $0x40] sm:$0xf] %vm682_vm0, %v1512_v22  ;;  %2802 = vmatmul.msk.bf16.gmra.mxu3 %vm1326_vm3, %v2954_v23 }
 0x345   : > { %v1426_v24 = vpop.f32.mrf.mxu2 }
 0x346   : > { %v1427_v25 = vadd.f32 %v3487_v32, %v1426_v24 }
 0x348   : > { %v1481_v26 = vmax.f32 %v1427_v25, 0.0 }
 0x34a   : > { %v1513_v27 = vpack.c.bf16 %v1481_v26, %v1481_v26 }
 0x34c   : > { %1545 = vst.msk [vmem:[#allocation2 + $0x44] sm:$0xf] %vm682_vm0, %v1513_v27 }
 0x34d   : > { %v1429_v28 = vpop.f32.mrf.mxu2 }
 0x34e   : > { %v1430_v29 = vadd.f32 %v3487_v32, %v1429_v28 }
 0x350   : > { %v1482_v30 = vmax.f32 %v1430_v29, 0.0 }
 0x352   : > { %v1514_v31 = vpack.c.bf16 %v1482_v30, %v1482_v30 }
 0x353   : > { %v2955_v33 = vld [vmem:[#allocation2 + $0x40] sm:$0xff] }
 0x354   : > { %1546 = vst.msk [vmem:[#allocation2 + $0x48] sm:$0xf] %vm682_vm0, %v1514_v31  ;;  %2803 = vmatmul.msk.bf16.gmra.mxu3 %vm1326_vm3, %v2955_v33 }
 0x355   : > { %v1431_v34 = vpop.f32.mrf.mxu2 }
 0x356   : > { %v1432_v36 = vadd.f32 %v3487_v32, %v1431_v34 }
 0x357   : > { %v1767_v38 = vpop.f32.mrf.mxu3 }
 0x358   : > { %v1483_v37 = vmax.f32 %v1432_v36, 0.0  ;;  %v1768_v39 = vadd.f32 %v3546_v35, %v1767_v38 }
 0x35a   : > { %v1515_v40 = vpack.c.bf16 %v1483_v37, %v1483_v37  ;;  %v1847_v41 = vmax.f32 %v1768_v39, 0.0 }
 0x35c   : > { %1547 = vst.msk [vmem:[#allocation2 + $0x4c] sm:$0xf] %vm682_vm0, %v1515_v40  ;;  %v1879_v42 = vpack.c.bf16 %v1847_v41, %v1847_v41 }
 0x35d   : > { %v1434_v7 = vpop.f32.mrf.mxu2 }
 0x35e   : > { %v1435_v43 = vadd.f32 %v3487_v32, %v1434_v7  ;;  %1943 = vrot.lane.b32.xlu2 %v1879_v42, %s3103_s26 }
 0x35f   : > { %v1769_v45 = vpop.f32.mrf.mxu3 }
 0x360   : > { %v1484_v44 = vmax.f32 %v1435_v43, 0.0  ;;  %v1770_v46 = vadd.f32 %v3546_v35, %v1769_v45 }
 0x362   : > { %v1516_v47 = vpack.c.bf16 %v1484_v44, %v1484_v44  ;;  %v1848_v48 = vmax.f32 %v1770_v46, 0.0 }
 0x363   : > { %v2956_v49 = vld [vmem:[#allocation2 + $0x48] sm:$0xff] }
 0x364   : > { %1548 = vst.msk [vmem:[#allocation2 + $0x50] sm:$0xf] %vm682_vm0, %v1516_v47  ;;  %v1880_v50 = vpack.c.bf16 %v1848_v48, %v1848_v48  ;;  %2804 = vmatmul.msk.bf16.gmra.mxu3 %vm1326_vm3, %v2956_v49 }
 0x365   : > { %v1436_v52 = vpop.f32.mrf.mxu2 }
 0x366   : > { %v1437_v53 = vadd.f32 %v3487_v32, %v1436_v52  ;;  %1945 = vrot.lane.b32.xlu0 %v1880_v50, %s3103_s26 }
 0x367   : > { %v1772_v55 = vpop.f32.mrf.mxu3 }
 0x368   : > { %v1485_v54 = vmax.f32 %v1437_v53, 0.0  ;;  %v1773_v56 = vadd.f32 %v3546_v35, %v1772_v55 }
 0x36a   : > { %v1517_v57 = vpack.c.bf16 %v1485_v54, %v1485_v54  ;;  %v1849_v58 = vmax.f32 %v1773_v56, 0.0 }
 0x36c   : > { %1549 = vst.msk [vmem:[#allocation2 + $0x54] sm:$0xf] %vm682_vm0, %v1517_v57  ;;  %v1881_v59 = vpack.c.bf16 %v1849_v58, %v1849_v58 }
 0x36d   : > { %v1439_v18 = vpop.f32.mrf.mxu2 }
 0x36e   : > { %v1440_v60 = vadd.f32 %v3487_v32, %v1439_v18  ;;  %1947 = vrot.lane.b32.xlu1 %v1881_v59, %s3103_s26 }
 0x36f   : > { %v1774_v62 = vpop.f32.mrf.mxu3 }
 0x370   : > { %v1486_v61 = vmax.f32 %v1440_v60, 0.0  ;;  %v1775_v63 = vadd.f32 %v3546_v35, %v1774_v62 }
 0x372   : > { %v1518_v0 = vpack.c.bf16 %v1486_v61, %v1486_v61  ;;  %v1850_v1 = vmax.f32 %v1775_v63, 0.0 }
 0x373   : > { %v2957_v2 = vld [vmem:[#allocation2 + $0x50] sm:$0xff] }
 0x374   : > { %1550 = vst.msk [vmem:[#allocation2 + $0x58] sm:$0xf] %vm682_vm0, %v1518_v0  ;;  %v1882_v3 = vpack.c.bf16 %v1850_v1, %v1850_v1  ;;  %2805 = vmatmul.msk.bf16.gmra.mxu3 %vm1326_vm3, %v2957_v2 }
 0x375   : > { %v1441_v4 = vpop.f32.mrf.mxu2 }
 0x376   : > { %v1442_v5 = vadd.f32 %v3487_v32, %v1441_v4  ;;  %1949 = vrot.lane.b32.xlu2 %v1882_v3, %s3103_s26 }
 0x377   : > { %v1777_v8 = vpop.f32.mrf.mxu3 }
 0x378   : > { %v1487_v6 = vmax.f32 %v1442_v5, 0.0  ;;  %v1778_v9 = vadd.f32 %v3546_v35, %v1777_v8 }
 0x37a   : > { %v1519_v10 = vpack.c.bf16 %v1487_v6, %v1487_v6  ;;  %v1851_v11 = vmax.f32 %v1778_v9, 0.0 }
 0x37c   : > { %1551 = vst.msk [vmem:[#allocation2 + $0x5c] sm:$0xf] %vm682_vm0, %v1519_v10  ;;  %v1883_v51 = vpack.c.bf16 %v1851_v11, %v1851_v11 }
 0x37d   : > { %v1444_v13 = vpop.f32.mrf.mxu2 }
 0x37e   : > { %v1445_v14 = vadd.f32 %v3487_v32, %v1444_v13  ;;  %1951 = vrot.lane.b32.xlu0 %v1883_v51, %s3103_s26 }
 0x37f   : > { %v1779_v16 = vpop.f32.mrf.mxu3 }
 0x380   : > { %v1488_v15 = vmax.f32 %v1445_v14, 0.0  ;;  %v1780_v17 = vadd.f32 %v3546_v35, %v1779_v16 }
 0x382   : > { %v1520_v19 = vpack.c.bf16 %v1488_v15, %v1488_v15  ;;  %v1852_v12 = vmax.f32 %v1780_v17, 0.0 }
 0x383   : > { %v2958_v20 = vld [vmem:[#allocation2 + $0x58] sm:$0xff] }
 0x384   : > { %1552 = vst.msk [vmem:[#allocation2 + $0x60] sm:$0xf] %vm682_vm0, %v1520_v19  ;;  %v1884_v21 = vpack.c.bf16 %v1852_v12, %v1852_v12  ;;  %2806 = vmatmul.msk.bf16.gmra.mxu3 %vm1326_vm3, %v2958_v20 }
 0x385   : > { %v1446_v22 = vpop.f32.mrf.mxu2 }
 0x386   : > { %v1447_v23 = vadd.f32 %v3487_v32, %v1446_v22  ;;  %1953 = vrot.lane.b32.xlu1 %v1884_v21, %s3103_s26 }
 0x387   : > { %v1782_v25 = vpop.f32.mrf.mxu3 }
 0x388   : > { %v1489_v24 = vmax.f32 %v1447_v23, 0.0  ;;  %v1783_v26 = vadd.f32 %v3546_v35, %v1782_v25 }
 0x38a   : > { %v1521_v27 = vpack.c.bf16 %v1489_v24, %v1489_v24  ;;  %v1853_v28 = vmax.f32 %v1783_v26, 0.0 }
 0x38c   : > { %1553 = vst.msk [vmem:[#allocation2 + $0x64] sm:$0xf] %vm682_vm0, %v1521_v27  ;;  %v1885_v29 = vpack.c.bf16 %v1853_v28, %v1853_v28 }
 0x38d   : > { %v1449_v30 = vpop.f32.mrf.mxu2 }
 0x38e   : > { %v1450_v31 = vadd.f32 %v3487_v32, %v1449_v30  ;;  %1955 = vrot.lane.b32.xlu2 %v1885_v29, %s3103_s26 }
 0x38f   : > { %v1784_v34 = vpop.f32.mrf.mxu3 }
 0x390   : > { %v1490_v33 = vmax.f32 %v1450_v31, 0.0  ;;  %v1785_v36 = vadd.f32 %v3546_v35, %v1784_v34 }
 0x392   : > { %v1522_v37 = vpack.c.bf16 %v1490_v33, %v1490_v33  ;;  %v1854_v38 = vmax.f32 %v1785_v36, 0.0 }
 0x393   : > { %v2959_v39 = vld [vmem:[#allocation2 + $0x60] sm:$0xff] }
 0x394   : > { %1554 = vst.msk [vmem:[#allocation2 + $0x68] sm:$0xf] %vm682_vm0, %v1522_v37  ;;  %v1886_v40 = vpack.c.bf16 %v1854_v38, %v1854_v38  ;;  %2807 = vmatmul.msk.bf16.gmra.mxu3 %vm1326_vm3, %v2959_v39 }
 0x395   : > { %v1451_v41 = vpop.f32.mrf.mxu2 }
 0x396   : > { %v1452_v42 = vadd.f32 %v3487_v32, %v1451_v41  ;;  %1957 = vrot.lane.b32.xlu0 %v1886_v40, %s3103_s26 }
 0x397   : > { %v1787_v43 = vpop.f32.mrf.mxu3 }
 0x398   : > { %v1491_v7 = vmax.f32 %v1452_v42, 0.0  ;;  %v1788_v44 = vadd.f32 %v3546_v35, %v1787_v43 }
 0x39a   : > { %v1523_v45 = vpack.c.bf16 %v1491_v7, %v1491_v7  ;;  %v1855_v46 = vmax.f32 %v1788_v44, 0.0 }
 0x39c   : > { %1555 = vst.msk [vmem:[#allocation2 + $0x6c] sm:$0xf] %vm682_vm0, %v1523_v45  ;;  %v1887_v47 = vpack.c.bf16 %v1855_v46, %v1855_v46  ;;  %v2984_v45 = vld [vmem:[%s3757_s7 + $0x8] sm:$0xff] }
 0x39d   : > { %v1454_v48 = vpop.f32.mrf.mxu2  ;;  %2285 = vmatpush.bf16.msrb.mxu1 %v2984_v45 }
 0x39e   : > { %v1455_v49 = vadd.f32 %v3487_v32, %v1454_v48  ;;  %1959 = vrot.lane.b32.xlu2 %v1887_v47, %s3103_s26 }
 0x39f   : > { %v1789_v52 = vpop.f32.mrf.mxu3 }
 0x3a0   : > { %v1492_v50 = vmax.f32 %v1455_v49, 0.0  ;;  %v1790_v53 = vadd.f32 %v3546_v35, %v1789_v52 }
 0x3a2   : > { %v1524_v54 = vpack.c.bf16 %v1492_v50, %v1492_v50  ;;  %v1856_v55 = vmax.f32 %v1790_v53, 0.0 }
 0x3a3   : > { %v2960_v56 = vld [vmem:[#allocation2 + $0x68] sm:$0xff] }
 0x3a4   : > { %1556 = vst.msk [vmem:[#allocation2 + $0x70] sm:$0xf] %vm682_vm0, %v1524_v54  ;;  %v1888_v57 = vpack.c.bf16 %v1856_v55, %v1856_v55  ;;  %2808 = vmatmul.msk.bf16.gmra.mxu3 %vm1326_vm3, %v2960_v56 }
 0x3a5   : > { %v1456_v58 = vpop.f32.mrf.mxu2 }
 0x3a6   : > { %v1457_v59 = vadd.f32 %v3487_v32, %v1456_v58  ;;  %1961 = vrot.lane.b32.xlu0 %v1888_v57, %s3103_s26 }
 0x3a7   : > { %v1792_v60 = vpop.f32.mrf.mxu3 }
 0x3a8   : > { %v1493_v18 = vmax.f32 %v1457_v59, 0.0  ;;  %v1793_v61 = vadd.f32 %v3546_v35, %v1792_v60 }
 0x3aa   : > { %v1525_v62 = vpack.c.bf16 %v1493_v18, %v1493_v18  ;;  %v1857_v63 = vmax.f32 %v1793_v61, 0.0 }
 0x3ac   : > { %1557 = vst.msk [vmem:[#allocation2 + $0x74] sm:$0xf] %vm682_vm0, %v1525_v62  ;;  %v1889_v0 = vpack.c.bf16 %v1857_v63, %v1857_v63 }
 0x3ad   : > { %v1459_v1 = vpop.f32.mrf.mxu2 }
 0x3ae   : > { %v1460_v2 = vadd.f32 %v3487_v32, %v1459_v1  ;;  %1963 = vrot.lane.b32.xlu2 %v1889_v0, %s3103_s26 }
 0x3af   : > { %v1794_v4 = vpop.f32.mrf.mxu3 }
 0x3b0   : > { %v1494_v3 = vmax.f32 %v1460_v2, 0.0  ;;  %v1795_v5 = vadd.f32 %v3546_v35, %v1794_v4 }
 0x3b2   : > { %v1526_v6 = vpack.c.bf16 %v1494_v3, %v1494_v3  ;;  %v1858_v8 = vmax.f32 %v1795_v5, 0.0 }
 0x3b3   : > { %v2961_v9 = vld [vmem:[#allocation2 + $0x70] sm:$0xff] }
 0x3b4   : > { %1558 = vst.msk [vmem:[#allocation2 + $0x78] sm:$0xf] %vm682_vm0, %v1526_v6  ;;  %v1890_v10 = vpack.c.bf16 %v1858_v8, %v1858_v8  ;;  %2809 = vmatmul.msk.bf16.gmra.mxu3 %vm1326_vm3, %v2961_v9 }
 0x3b5   : > { %v1461_v11 = vpop.f32.mrf.mxu2 }
 0x3b6   : > { %v1462_v51 = vadd.f32 %v3487_v32, %v1461_v11  ;;  %1965 = vrot.lane.b32.xlu0 %v1890_v10, %s3103_s26  ;;  %v2983_v11 = vld [vmem:[%s3757_s7] sm:$0xff] }
 0x3b7   : > { %v1797_v14 = vpop.f32.mrf.mxu3  ;;  %2286 = vmatpush.bf16.msrb.mxu1 %v2983_v11 }
 0x3b8   : > { %v1495_v13 = vmax.f32 %v1462_v51, 0.0  ;;  %v1798_v15 = vadd.f32 %v3546_v35, %v1797_v14  ;;  %v1944_v16 = vpop.permute.xlu2 %1943 }
 0x3b9   : > { %2039 = vst.msk [vmem:[#allocation2] sm:$0xf] %vm1145_vm2, %v1944_v16 }
 0x3ba   : > { %v1527_v17 = vpack.c.bf16 %v1495_v13, %v1495_v13  ;;  %v1859_v19 = vmax.f32 %v1798_v15, 0.0 }
 0x3bc   : > { %1559 = vst.msk [vmem:[#allocation2 + $0x7c] sm:$0xf] %vm682_vm0, %v1527_v17  ;;  %v1891_v12 = vpack.c.bf16 %v1859_v19, %v1859_v19 }
 0x3be   : > { %1967 = vrot.lane.b32.xlu2 %v1891_v12, %s3103_s26 }
 0x3bf   : > { %v1799_v20 = vpop.f32.mrf.mxu3 }
 0x3c0   : > { %v1800_v21 = vadd.f32 %v3546_v35, %v1799_v20 }
 0x3c2   : > { %v1860_v32 = vmax.f32 %v1800_v21, 0.0 }
 0x3c3   : > { %v2962_v22 = vld [vmem:[#allocation2 + $0x78] sm:$0xff] }
 0x3c4   : > { %v1892_v23 = vpack.c.bf16 %v1860_v32, %v1860_v32  ;;  %2810 = vmatmul.msk.bf16.gmra.mxu3 %vm1326_vm3, %v2962_v22 }
 0x3c6   : > { %1969 = vrot.lane.b32.xlu0 %v1892_v23, %s3103_s26 }
 0x3c7   : > { %v1802_v24 = vpop.f32.mrf.mxu3 }
 0x3c8   : > { %v1803_v25 = vadd.f32 %v3546_v35, %v1802_v24 }
 0x3ca   : > { %v1861_v26 = vmax.f32 %v1803_v25, 0.0 }
 0x3cc   : > { %v1893_v27 = vpack.c.bf16 %v1861_v26, %v1861_v26 }
 0x3ce   : > { %1971 = vrot.lane.b32.xlu2 %v1893_v27, %s3103_s26 }
 0x3cf   : > { %v1804_v28 = vpop.f32.mrf.mxu3 }
 0x3d0   : > { %v1805_v29 = vadd.f32 %v3546_v35, %v1804_v28  ;;  %v1950_v30 = vpop.permute.xlu2 %1949 }
 0x3d1   : > { %2042 = vst.msk [vmem:[#allocation2 + $0xc] sm:$0xf] %vm1145_vm2, %v1950_v30 }
 0x3d2   : > { %v1862_v31 = vmax.f32 %v1805_v29, 0.0 }
 0x3d4   : > { %v1894_v33 = vpack.c.bf16 %v1862_v31, %v1862_v31 }
 0x3d6   : > { %1973 = vrot.lane.b32.xlu0 %v1894_v33, %s3103_s26 }
 0x3d7   : > { %v1807_v34 = vpop.f32.mrf.mxu3 }
 0x3d8   : > { %v1808_v36 = vadd.f32 %v3546_v35, %v1807_v34  ;;  %v1946_v37 = vpop.permute.xlu0 %1945 }
 0x3d9   : > { %2040 = vst.msk [vmem:[#allocation2 + $0x4] sm:$0xf] %vm1145_vm2, %v1946_v37 }
 0x3da   : > { %v1863_v38 = vmax.f32 %v1808_v36, 0.0 }
 0x3dc   : > { %v1895_v39 = vpack.c.bf16 %v1863_v38, %v1863_v38 }
 0x3de   : > { %1975 = vrot.lane.b32.xlu2 %v1895_v39, %s3103_s26 }
 0x3df   : > { %v1809_v40 = vpop.f32.mrf.mxu3 }
 0x3e0   : > { %v1810_v41 = vadd.f32 %v3546_v35, %v1809_v40  ;;  %v1948_v42 = vpop.permute.xlu1 %1947  ;;  %v2967_v7 = vld [vmem:[#allocation2] sm:$0xff] }
 0x3e1   : > { %2041 = vst.msk [vmem:[#allocation2 + $0x8] sm:$0xf] %vm1145_vm2, %v1948_v42  ;;  %2187 = vrot.lane.b32.xlu1 %v2967_v7, %s3104_s24 }
 0x3e2   : > { %v1864_v43 = vmax.f32 %v1810_v41, 0.0 }
 0x3e4   : > { %v1896_v44 = vpack.c.bf16 %v1864_v43, %v1864_v43 }
 0x3e6   : > { %1977 = vrot.lane.b32.xlu0 %v1896_v44, %s3103_s26 }
 0x3e7   : > { %v1812_v46 = vpop.f32.mrf.mxu3 }
 0x3e8   : > { %v1813_v47 = vadd.f32 %v3546_v35, %v1812_v46  ;;  %v1956_v48 = vpop.permute.xlu2 %1955  ;;  %v2968_v49 = vld [vmem:[#allocation2 + $0x8] sm:$0xff] }
 0x3e9   : > { %2045 = vst.msk [vmem:[#allocation2 + $0x18] sm:$0xf] %vm1145_vm2, %v1956_v48  ;;  %2189 = vrot.lane.b32.xlu1 %v2968_v49, %s3104_s24 }
 0x3ea   : > { %v1865_v50 = vmax.f32 %v1813_v47, 0.0 }
 0x3ec   : > { %v1897_v52 = vpack.c.bf16 %v1865_v50, %v1865_v50 }
 0x3ee   : > { %1979 = vrot.lane.b32.xlu2 %v1897_v52, %s3103_s26 }
 0x3ef   : > { %v1814_v53 = vpop.f32.mrf.mxu3 }
 0x3f0   : > { %v1815_v54 = vadd.f32 %v3546_v35, %v1814_v53  ;;  %v1952_v55 = vpop.permute.xlu0 %1951 }
 0x3f1   : > { %2043 = vst.msk [vmem:[#allocation2 + $0x10] sm:$0xf] %vm1145_vm2, %v1952_v55 }
 0x3f2   : > { %v1866_v56 = vmax.f32 %v1815_v54, 0.0 }
 0x3f4   : > { %v1898_v57 = vpack.c.bf16 %v1866_v56, %v1866_v56 }
 0x3f6   : > { %1981 = vrot.lane.b32.xlu0 %v1898_v57, %s3103_s26 }
 0x3f7   : > { %v1817_v58 = vpop.f32.mrf.mxu3 }
 0x3f8   : > { %v1818_v59 = vadd.f32 %v3546_v35, %v1817_v58  ;;  %v1954_v18 = vpop.permute.xlu1 %1953  ;;  %v1960_v60 = vpop.permute.xlu2 %1959 }
 0x3f9   : > { %2044 = vst.msk [vmem:[#allocation2 + $0x14] sm:$0xf] %vm1145_vm2, %v1954_v18 }
 0x3fa   : > { %v1867_v61 = vmax.f32 %v1818_v59, 0.0  ;;  %2047 = vst.msk [vmem:[#allocation2 + $0x20] sm:$0xf] %vm1145_vm2, %v1960_v60 }
 0x3fc   : > { %v1899_v62 = vpack.c.bf16 %v1867_v61, %v1867_v61 }
 0x3fe   : > { %1983 = vrot.lane.b32.xlu2 %v1899_v62, %s3103_s26 }
 0x3ff   : > { %v1819_v63 = vpop.f32.mrf.mxu3 }
 0x400   : > { %v1820_v0 = vadd.f32 %v3546_v35, %v1819_v63  ;;  %v2969_v1 = vld [vmem:[#allocation2 + $0x10] sm:$0xff] }
 0x401   : > { %2191 = vrot.lane.b32.xlu1 %v2969_v1, %s3104_s24 }
 0x402   : > { %v1868_v2 = vmax.f32 %v1820_v0, 0.0 }
 0x404   : > { %v1900_v3 = vpack.c.bf16 %v1868_v2, %v1868_v2 }
 0x406   : > { %1985 = vrot.lane.b32.xlu0 %v1900_v3, %s3103_s26 }
 0x407   : > { %v1822_v4 = vpop.f32.mrf.mxu3 }
 0x408   : > { %v1823_v5 = vadd.f32 %v3546_v35, %v1822_v4  ;;  %v1958_v6 = vpop.permute.xlu0 %1957  ;;  %v1964_v8 = vpop.permute.xlu2 %1963 }
 0x409   : > { %2046 = vst.msk [vmem:[#allocation2 + $0x1c] sm:$0xf] %vm1145_vm2, %v1958_v6 }
 0x40a   : > { %v1869_v9 = vmax.f32 %v1823_v5, 0.0  ;;  %2049 = vst.msk [vmem:[#allocation2 + $0x28] sm:$0xf] %vm1145_vm2, %v1964_v8 }
 0x40c   : > { %v1901_v10 = vpack.c.bf16 %v1869_v9, %v1869_v9 }
 0x40e   : > { %1987 = vrot.lane.b32.xlu2 %v1901_v10, %s3103_s26 }
 0x40f   : > { %v1824_v51 = vpop.f32.mrf.mxu3 }
 0x410   : > { %v1825_v13 = vadd.f32 %v3546_v35, %v1824_v51  ;;  %v2970_v14 = vld [vmem:[#allocation2 + $0x18] sm:$0xff] }
 0x411   : > { %2193 = vrot.lane.b32.xlu1 %v2970_v14, %s3104_s24 }
 0x412   : > { %v1870_v15 = vmax.f32 %v1825_v13, 0.0 }
 0x414   : > { %v1902_v16 = vpack.c.bf16 %v1870_v15, %v1870_v15 }
 0x416   : > { %1989 = vrot.lane.b32.xlu0 %v1902_v16, %s3103_s26 }
 0x417   : > { %v1827_v17 = vpop.f32.mrf.mxu3 }
 0x418   : > { %v1828_v19 = vadd.f32 %v3546_v35, %v1827_v17  ;;  %v1962_v12 = vpop.permute.xlu0 %1961  ;;  %v1968_v20 = vpop.permute.xlu2 %1967 }
 0x419   : > { %2048 = vst.msk [vmem:[#allocation2 + $0x24] sm:$0xf] %vm1145_vm2, %v1962_v12 }
 0x41a   : > { %v1871_v21 = vmax.f32 %v1828_v19, 0.0  ;;  %2051 = vst.msk [vmem:[#allocation2 + $0x30] sm:$0xf] %vm1145_vm2, %v1968_v20 }
 0x41c   : > { %v1903_v32 = vpack.c.bf16 %v1871_v21, %v1871_v21 }
 0x41e   : > { %1991 = vrot.lane.b32.xlu2 %v1903_v32, %s3103_s26 }
 0x41f   : > { %v1829_v22 = vpop.f32.mrf.mxu3 }
 0x420   : > { %v1830_v23 = vadd.f32 %v3546_v35, %v1829_v22  ;;  %v2971_v24 = vld [vmem:[#allocation2 + $0x20] sm:$0xff] }
 0x421   : > { %2195 = vrot.lane.b32.xlu1 %v2971_v24, %s3104_s24 }
 0x422   : > { %v1872_v25 = vmax.f32 %v1830_v23, 0.0 }
 0x424   : > { %v1904_v26 = vpack.c.bf16 %v1872_v25, %v1872_v25 }
 0x426   : > { %1993 = vrot.lane.b32.xlu0 %v1904_v26, %s3103_s26 }
 0x427   : > { %v1832_v27 = vpop.f32.mrf.mxu3 }
 0x428   : > { %v1833_v28 = vadd.f32 %v3546_v35, %v1832_v27  ;;  %v1966_v29 = vpop.permute.xlu0 %1965  ;;  %v1972_v30 = vpop.permute.xlu2 %1971 }
 0x429   : > { %2050 = vst.msk [vmem:[#allocation2 + $0x2c] sm:$0xf] %vm1145_vm2, %v1966_v29 }
 0x42a   : > { %v1873_v31 = vmax.f32 %v1833_v28, 0.0  ;;  %2053 = vst.msk [vmem:[#allocation2 + $0x38] sm:$0xf] %vm1145_vm2, %v1972_v30 }
 0x42c   : > { %v1905_v33 = vpack.c.bf16 %v1873_v31, %v1873_v31 }
 0x42e   : > { %1995 = vrot.lane.b32.xlu2 %v1905_v33, %s3103_s26 }
 0x42f   : > { %v1834_v34 = vpop.f32.mrf.mxu3 }
 0x430   : > { %v1835_v36 = vadd.f32 %v3546_v35, %v1834_v34  ;;  %v2972_v37 = vld [vmem:[#allocation2 + $0x28] sm:$0xff] }
 0x431   : > { %2197 = vrot.lane.b32.xlu1 %v2972_v37, %s3104_s24 }
 0x432   : > { %v1874_v38 = vmax.f32 %v1835_v36, 0.0 }
 0x434   : > { %v1906_v39 = vpack.c.bf16 %v1874_v38, %v1874_v38 }
 0x436   : > { %1997 = vrot.lane.b32.xlu0 %v1906_v39, %s3103_s26 }
 0x437   : > { %v1837_v40 = vpop.f32.mrf.mxu3 }
 0x438   : > { %v1838_v41 = vadd.f32 %v3546_v35, %v1837_v40  ;;  %v1970_v42 = vpop.permute.xlu0 %1969  ;;  %v1976_v7 = vpop.permute.xlu2 %1975 }
 0x439   : > { %2052 = vst.msk [vmem:[#allocation2 + $0x34] sm:$0xf] %vm1145_vm2, %v1970_v42 }
 0x43a   : > { %v1875_v43 = vmax.f32 %v1838_v41, 0.0  ;;  %2055 = vst.msk [vmem:[#allocation2 + $0x40] sm:$0xf] %vm1145_vm2, %v1976_v7 }
 0x43c   : > { %v1907_v44 = vpack.c.bf16 %v1875_v43, %v1875_v43 }
 0x43e   : > { %1999 = vrot.lane.b32.xlu2 %v1907_v44, %s3103_s26 }
 0x43f   : > { %v1839_v45 = vpop.f32.mrf.mxu3 }
 0x440   : > { %v1840_v46 = vadd.f32 %v3546_v35, %v1839_v45  ;;  %v2973_v47 = vld [vmem:[#allocation2 + $0x30] sm:$0xff] }
 0x441   : > { %2199 = vrot.lane.b32.xlu1 %v2973_v47, %s3104_s24 }
 0x442   : > { %v1876_v48 = vmax.f32 %v1840_v46, 0.0 }
 0x444   : > { %v1908_v49 = vpack.c.bf16 %v1876_v48, %v1876_v48 }
 0x446   : > { %2001 = vrot.lane.b32.xlu0 %v1908_v49, %s3103_s26 }
 0x447   : > { %v1842_v50 = vpop.f32.mrf.mxu3 }
 0x448   : > { %v1843_v52 = vadd.f32 %v3546_v35, %v1842_v50  ;;  %v1974_v53 = vpop.permute.xlu0 %1973  ;;  %v1980_v54 = vpop.permute.xlu2 %1979 }
 0x449   : > { %2054 = vst.msk [vmem:[#allocation2 + $0x3c] sm:$0xf] %vm1145_vm2, %v1974_v53 }
 0x44a   : > { %v1877_v55 = vmax.f32 %v1843_v52, 0.0  ;;  %2057 = vst.msk [vmem:[#allocation2 + $0x48] sm:$0xf] %vm1145_vm2, %v1980_v54 }
 0x44c   : > { %v1909_v56 = vpack.c.bf16 %v1877_v55, %v1877_v55 }
 0x44e   : > { %2003 = vrot.lane.b32.xlu2 %v1909_v56, %s3103_s26 }
 0x44f   : > { %v1844_v57 = vpop.f32.mrf.mxu3 }
 0x450   : > { %v1845_v58 = vadd.f32 %v3546_v35, %v1844_v57  ;;  %v2974_v59 = vld [vmem:[#allocation2 + $0x38] sm:$0xff] }
 0x451   : > { %2201 = vrot.lane.b32.xlu1 %v2974_v59, %s3104_s24 }
 0x452   : > { %v1878_v18 = vmax.f32 %v1845_v58, 0.0 }
 0x453   : > { %v2188_v61 = vpop.permute.xlu1 %2187 }
 0x454   : > { %v1910_v60 = vpack.c.bf16 %v1878_v18, %v1878_v18  ;;  %2883 = vmatmul.msk.bf16.vlgmr.msrb.gmra.mxu1 %vm815_vm1, %v2188_v61 }
 0x456   : > { %2005 = vrot.lane.b32.xlu0 %v1910_v60, %s3103_s26  ;;  %s324_s26 = sand.u32 1, %s3093_s10  }
 0x457   : > { %s325_s23 = scalar_lea.vmem [#allocation3], %s324_s26  ;;  %s2417_s27 = scalar_lea.sflag [#allocation4], %s324_s26 }
 0x458   : > { %v1978_v62 = vpop.permute.xlu0 %1977  ;;  %v1984_v63 = vpop.permute.xlu2 %1983 }
 0x459   : > { %2056 = vst.msk [vmem:[#allocation2 + $0x44] sm:$0xf] %vm1145_vm2, %v1978_v62 }
 0x45a   : > { %2059 = vst.msk [vmem:[#allocation2 + $0x50] sm:$0xf] %vm1145_vm2, %v1984_v63 }
 0x45b   : > { %v2190_v35 = vpop.permute.xlu1 %2189 }
 0x460   : > { %v2975_v0 = vld [vmem:[#allocation2 + $0x40] sm:$0xff] }
 0x461   : > { %2203 = vrot.lane.b32.xlu1 %v2975_v0, %s3104_s24 }
 0x464   : > { %2884 = vmatmul.msk.bf16.gmra.mxu1 %vm815_vm1, %v2190_v35 }
 0x468   : > { %v1982_v1 = vpop.permute.xlu0 %1981  ;;  %v1988_v2 = vpop.permute.xlu2 %1987 }
 0x469   : > { %2058 = vst.msk [vmem:[#allocation2 + $0x4c] sm:$0xf] %vm1145_vm2, %v1982_v1 }
 0x46a   : > { %2061 = vst.msk [vmem:[#allocation2 + $0x58] sm:$0xf] %vm1145_vm2, %v1988_v2 }
 0x470   : > { %v2976_v3 = vld [vmem:[#allocation2 + $0x48] sm:$0xff] }
 0x471   : > { %2205 = vrot.lane.b32.xlu1 %v2976_v3, %s3104_s24 }
 0x473   : > { %v2192_v4 = vpop.permute.xlu1 %2191 }
 0x474   : > { %2885 = vmatmul.msk.bf16.gmra.mxu1 %vm815_vm1, %v2192_v4 }
 0x478   : > { %v1986_v5 = vpop.permute.xlu0 %1985  ;;  %v1992_v6 = vpop.permute.xlu2 %1991 }
 0x479   : > { %2060 = vst.msk [vmem:[#allocation2 + $0x54] sm:$0xf] %vm1145_vm2, %v1986_v5 }
 0x47a   : > { %2063 = vst.msk [vmem:[#allocation2 + $0x60] sm:$0xf] %vm1145_vm2, %v1992_v6 }
 0x480   : > { %v2977_v8 = vld [vmem:[#allocation2 + $0x50] sm:$0xff] }
 0x481   : > { %2207 = vrot.lane.b32.xlu1 %v2977_v8, %s3104_s24 }
 0x483   : > { %v2194_v9 = vpop.permute.xlu1 %2193 }
 0x484   : > { %2886 = vmatmul.msk.bf16.gmra.mxu1 %vm815_vm1, %v2194_v9 }
 0x488   : > { %v1990_v10 = vpop.permute.xlu0 %1989  ;;  %v1996_v11 = vpop.permute.xlu2 %1995 }
 0x489   : > { %2062 = vst.msk [vmem:[#allocation2 + $0x5c] sm:$0xf] %vm1145_vm2, %v1990_v10 }
 0x48a   : > { %2065 = vst.msk [vmem:[#allocation2 + $0x68] sm:$0xf] %vm1145_vm2, %v1996_v11 }
 0x490   : > { %v2978_v51 = vld [vmem:[#allocation2 + $0x58] sm:$0xff] }
 0x491   : > { %2209 = vrot.lane.b32.xlu1 %v2978_v51, %s3104_s24 }
 0x493   : > { %v2196_v13 = vpop.permute.xlu1 %2195 }
 0x494   : > { %2887 = vmatmul.msk.bf16.gmra.mxu1 %vm815_vm1, %v2196_v13 }
 0x498   : > { %v1994_v14 = vpop.permute.xlu0 %1993  ;;  %v2000_v15 = vpop.permute.xlu2 %1999 }
 0x499   : > { %2064 = vst.msk [vmem:[#allocation2 + $0x64] sm:$0xf] %vm1145_vm2, %v1994_v14 }
 0x49a   : > { %2067 = vst.msk [vmem:[#allocation2 + $0x70] sm:$0xf] %vm1145_vm2, %v2000_v15 }
 0x4a0   : > { %v2979_v16 = vld [vmem:[#allocation2 + $0x60] sm:$0xff] }
 0x4a1   : > { %2211 = vrot.lane.b32.xlu1 %v2979_v16, %s3104_s24 }
 0x4a3   : > { %v2198_v17 = vpop.permute.xlu1 %2197 }
 0x4a4   : > { %2888 = vmatmul.msk.bf16.gmra.mxu1 %vm815_vm1, %v2198_v17 }
 0x4a8   : > { %v1998_v19 = vpop.permute.xlu0 %1997  ;;  %v2004_v12 = vpop.permute.xlu2 %2003 }
 0x4a9   : > { %2066 = vst.msk [vmem:[#allocation2 + $0x6c] sm:$0xf] %vm1145_vm2, %v1998_v19 }
 0x4aa   : > { %2069 = vst.msk [vmem:[#allocation2 + $0x78] sm:$0xf] %vm1145_vm2, %v2004_v12 }
 0x4b0   : > { %v2980_v20 = vld [vmem:[#allocation2 + $0x68] sm:$0xff] }
 0x4b1   : > { %2213 = vrot.lane.b32.xlu2 %v2980_v20, %s3104_s24 }
 0x4b3   : > { %v2200_v21 = vpop.permute.xlu1 %2199 }
 0x4b4   : > { %2889 = vmatmul.msk.bf16.gmra.mxu1 %vm815_vm1, %v2200_v21 }
 0x4b8   : > { %v2002_v32 = vpop.permute.xlu0 %2001 }
 0x4b9   : > { %2068 = vst.msk [vmem:[#allocation2 + $0x74] sm:$0xf] %vm1145_vm2, %v2002_v32 }
 0x4c0   : > { %v2981_v22 = vld [vmem:[#allocation2 + $0x70] sm:$0xff] }
 0x4c1   : > { %2215 = vrot.lane.b32.xlu0 %v2981_v22, %s3104_s24 }
 0x4c3   : > { %v2202_v23 = vpop.permute.xlu1 %2201 }
 0x4c4   : > { %2890 = vmatmul.msk.bf16.gmra.mxu1 %vm815_vm1, %v2202_v23 }
 0x4c8   : > { %v2006_v24 = vpop.permute.xlu0 %2005 }
 0x4c9   : > { %2070 = vst.msk [vmem:[#allocation2 + $0x7c] sm:$0xf] %vm1145_vm2, %v2006_v24  ;;  %v3105_v24 = vmov 256.0  }
 0x4ca   : > { %3037 = vrcp.f32 %v3105_v24 }
 0x4d0   : > { %v2982_v25 = vld [vmem:[#allocation2 + $0x78] sm:$0xff] }
 0x4d1   : > { %v2288_v26 = vpop.f32.mrf.mxu1  ;;  %2217 = vrot.lane.b32.xlu1 %v2982_v25, %s3104_s24  ;;  %s2427_s24 = sshll.u32 %s325_s23, 4  ;;  %s2428_s24 = int_to_ptr.vmem [resolvable:$true] %s2427_s24 }
 0x4d3   : > { %v2204_v27 = vpop.permute.xlu1 %2203 }
 0x4d4   : > { %2891 = vmatmul.msk.bf16.gmra.mxu1 %vm815_vm1, %v2204_v27 }
 0x4d9   : > { %v2290_v28 = vpop.f32.mrf.mxu1 }
 0x4da   : > { %v2368_v29 = vadd.f32 %v2290_v28, %v2288_v26  ;;  %v3038_v28 = vpop.eup %3037 }
 0x4db   : > { %vm2410_vm4 = vweird.f32 %v3038_v28 }
 0x4e1   : > { %v2293_v30 = vpop.f32.mrf.mxu1 }
 0x4e2   : > { %v2369_v31 = vadd.f32 %v2368_v29, %v2293_v30 }
 0x4e3   : > { %v2206_v33 = vpop.permute.xlu1 %2205 }
 0x4e4   : > { %2892 = vmatmul.msk.bf16.gmra.mxu1 %vm815_vm1, %v2206_v33 }
 0x4e9   : > { %v2295_v34 = vpop.f32.mrf.mxu1 }
 0x4ea   : > { %v2370_v36 = vadd.f32 %v2369_v31, %v2295_v34  ;;  %v2406_v31 = vmul.f32 256.0, %v3038_v28 }
 0x4f1   : > { %v2298_v37 = vpop.f32.mrf.mxu1 }
 0x4f2   : > { %v2371_v38 = vadd.f32 %v2370_v36, %v2298_v37  ;;  %v2407_v37 = vsub.f32 1.0, %v2406_v31 }
 0x4f3   : > { %v2208_v39 = vpop.permute.xlu1 %2207 }
 0x4f4   : > { %2893 = vmatmul.msk.bf16.gmra.mxu1 %vm815_vm1, %v2208_v39 }
 0x4f9   : > { %v2300_v40 = vpop.f32.mrf.mxu1 }
 0x4fa   : > { %v2372_v41 = vadd.f32 %v2371_v38, %v2300_v40  ;;  %v2408_v40 = vmul.f32 %v3038_v28, %v2407_v37 }
 0x501   : > { %v2303_v42 = vpop.f32.mrf.mxu1 }
 0x502   : > { %v2373_v7 = vadd.f32 %v2372_v41, %v2303_v42 }
 0x503   : > { %v2210_v43 = vpop.permute.xlu1 %2209 }
 0x504   : > { %2894 = vmatmul.msk.bf16.gmra.mxu1 %vm815_vm1, %v2210_v43 }
 0x509   : > { %v2305_v44 = vpop.f32.mrf.mxu1 }
 0x50a   : > { %v2374_v45 = vadd.f32 %v2373_v7, %v2305_v44  ;;  %v2409_v7 = vadd.f32 %v3038_v28, %v2408_v40 }
 0x50b   : > { %v2214_v54 = vpop.permute.xlu2 %2213 }
 0x511   : > { %v2308_v46 = vpop.f32.mrf.mxu1 }
 0x512   : > { %v2375_v47 = vadd.f32 %v2374_v45, %v2308_v46  ;;  %v2411_v45 = vsel %vm2410_vm4, %v3038_v28, %v2409_v7 }
 0x513   : > { %v2212_v48 = vpop.permute.xlu1 %2211 }
 0x514   : > { %2895 = vmatmul.msk.bf16.gmra.mxu1 %vm815_vm1, %v2212_v48 }
 0x519   : > { %v2310_v49 = vpop.f32.mrf.mxu1 }
 0x51a   : > { %v2376_v50 = vadd.f32 %v2375_v47, %v2310_v49  ;;  %v2413_v47 = vld [vmem:[%s3758_s8] sm:$0x1] }
 0x521   : > { %v2313_v52 = vpop.f32.mrf.mxu1 }
 0x522   : > { %v2377_v53 = vadd.f32 %v2376_v50, %v2313_v52 }
 0x524   : > { %2896 = vmatmul.msk.bf16.gmra.mxu1 %vm815_vm1, %v2214_v54 }
 0x529   : > { %v2315_v55 = vpop.f32.mrf.mxu1 }
 0x52a   : > { %v2378_v56 = vadd.f32 %v2377_v53, %v2315_v55 }
 0x531   : > { %v2318_v57 = vpop.f32.mrf.mxu1 }
 0x532   : > { %v2379_v58 = vadd.f32 %v2378_v56, %v2318_v57 }
 0x533   : > { %v2216_v59 = vpop.permute.xlu0 %2215 }
 0x534   : > { %2897 = vmatmul.msk.bf16.gmra.mxu1 %vm815_vm1, %v2216_v59 }
 0x539   : > { %v2320_v18 = vpop.f32.mrf.mxu1 }
 0x53a   : > { %v2380_v60 = vadd.f32 %v2379_v58, %v2320_v18 }
 0x541   : > { %v2323_v61 = vpop.f32.mrf.mxu1 }
 0x542   : > { %v2381_v62 = vadd.f32 %v2380_v60, %v2323_v61 }
 0x543   : > { %v2218_v63 = vpop.permute.xlu1 %2217 }
 0x544   : > { %2898 = vmatmul.msk.bf16.gmra.mxu1 %vm815_vm1, %v2218_v63 }
 0x549   : > { %v2325_v0 = vpop.f32.mrf.mxu1 }
 0x54a   : > { %v2382_v35 = vadd.f32 %v2381_v62, %v2325_v0 }
 0x551   : > { %v2328_v1 = vpop.f32.mrf.mxu1 }
 0x552   : > { %v2383_v2 = vadd.f32 %v2382_v35, %v2328_v1 }
 0x559   : > { %v2330_v3 = vpop.f32.mrf.mxu1 }
 0x55a   : > { %v2384_v4 = vadd.f32 %v2383_v2, %v2330_v3 }
 0x561   : > { %v2333_v5 = vpop.f32.mrf.mxu1 }
 0x562   : > { %v2385_v6 = vadd.f32 %v2384_v4, %v2333_v5 }
 0x569   : > { %v2335_v8 = vpop.f32.mrf.mxu1 }
 0x56a   : > { %v2386_v9 = vadd.f32 %v2385_v6, %v2335_v8 }
 0x571   : > { %v2338_v10 = vpop.f32.mrf.mxu1 }
 0x572   : > { %v2387_v11 = vadd.f32 %v2386_v9, %v2338_v10 }
 0x579   : > { %v2340_v51 = vpop.f32.mrf.mxu1 }
 0x57a   : > { %v2388_v20 = vadd.f32 %v2387_v11, %v2340_v51 }
 0x581   : > { %v2343_v13 = vpop.f32.mrf.mxu1 }
 0x582   : > { %v2389_v21 = vadd.f32 %v2388_v20, %v2343_v13 }
 0x589   : > { %v2345_v14 = vpop.f32.mrf.mxu1 }
 0x58a   : > { %v2390_v22 = vadd.f32 %v2389_v21, %v2345_v14 }
 0x591   : > { %v2348_v15 = vpop.f32.mrf.mxu1 }
 0x592   : > { %v2391_v23 = vadd.f32 %v2390_v22, %v2348_v15 }
 0x599   : > { %v2350_v16 = vpop.f32.mrf.mxu1 }
 0x59a   : > { %v2392_v25 = vadd.f32 %v2391_v23, %v2350_v16 }
 0x5a1   : > { %v2353_v17 = vpop.f32.mrf.mxu1 }
 0x5a2   : > { %v2393_v26 = vadd.f32 %v2392_v25, %v2353_v17 }
 0x5a9   : > { %v2355_v19 = vpop.f32.mrf.mxu1 }
 0x5aa   : > { %v2394_v29 = vadd.f32 %v2393_v26, %v2355_v19 }
 0x5b1   : > { %v2358_v12 = vpop.f32.mrf.mxu1 }
 0x5b2   : > { %v2395_v30 = vadd.f32 %v2394_v29, %v2358_v12 }
 0x5b9   : > { %v2360_v32 = vpop.f32.mrf.mxu1 }
 0x5ba   : > { %v2396_v33 = vadd.f32 %v2395_v30, %v2360_v32 }
 0x5c1   : > { %v2363_v27 = vpop.f32.mrf.mxu1 }
 0x5c2   : > { %v2397_v34 = vadd.f32 %v2396_v33, %v2363_v27 }
 0x5c9   : > { %v2365_v36 = vpop.f32.mrf.mxu1 }
 0x5ca   : > { %v2398_v38 = vadd.f32 %v2397_v34, %v2365_v36 }
 0x5cc   : > { %v2399_v39 = vrot.slane %v2398_v38, 4 }
 0x5ce   : > { %v2400_v41 = vadd.f32 %v2399_v39, %v2398_v38 }
 0x5d0   : > { %v2401_v42 = vrot.slane %v2400_v41, 2 }
 0x5d2   : > { %v2402_v43 = vadd.f32 %v2401_v42, %v2400_v41 }
 0x5d4   : > { %v2403_v44 = vrot.slane %v2402_v43, 1 }
 0x5d6   : > { %v2404_v46 = vadd.f32 %v2403_v44, %v2402_v43 }
 0x5d8   : > { %v2412_v48 = vmul.f32 %v2411_v45, %v2404_v46 }
 0x5da   : > { %v2414_v49 = vadd.f32 %v2413_v47, %v2412_v48 }
 0x5dc   : > { %2415 = vst [vmem:[%s325_s23] sm:$0x1] %v2414_v49 }
 0x5dd   : > { %3066 = shalt.err (!%p3063_p3)
}
 0x5de   : > { %2991 = dma.vmem_to_hbm [thread:$0]  (%p3194_p5), %s2428_s24, 16, %s2430_s25, %s2417_s27  }
 0x5df PF: > { %p2997_p4 = scmp.ge.s32.totalorder %s3101_s12, 2  ;;  %s2441_s26 = sand.u32 1, %s3089_s30  }
 0x5e0   : > { %s2442_s16 = scalar_lea.sflag [#allocation4], %s2441_s26 }
 0x5e1   : > { %p2994_p7 = pnand %p2997_p4, %p3198_p6 }
 0x5e3   : > { %p2995_p8 = pneg %p2994_p7 }
 0x5e5   : > { %3084 = dma.done.wait (%p2995_p8), %s2442_s16, 16  }
 0x5e6   : > { %3086 = vsyncadd (%p2995_p8), %s2442_s16, 4294967280  ;;  %p19_p9 = scmp.ge.s32.totalorder %s3181_s15, 4   ;;  %s3762_s30 = smov %s3093_s10 }
 0x5e7   : > { %s3763_s10 = smov %s3097_s11  ;;  %s3764_s11 = smov %s3192_s18 }
 0x5e8   : > { %s3765_s12 = smov %s3181_s15  ;;  %21 = sbr.rel (!%p19_p9) target bundleno = 3 (0x3), region = 93 }
 0x5ed   :  { %2447 = vsyncpa [#allocation4], 1 }
 0x5ee   :  { %2449 = vsyncpa [#allocation4 + $0x1], 1 }

</bundles_post_ra>
